<compile_context>
chip_gen: v6e
topology: v6e:2x2x1
jax: 0.10.0
libtpu: 0.0.40
codegen_flags: <defaults>
</compile_context>

<pallas_src>
import numpy as np
import jax
import jax.numpy as jnp
from jax.experimental import pallas as pl
from jax.experimental.pallas import tpu as pltpu


def _round_up(x, m):
    return (x + m - 1) // m * m


def _multiway_kernel(eid_ref, mix_ref, x_ref, eidv_ref, w_ref, b_ref, o_ref):
    # eid_ref  : SMEM (n_row_tiles,) int32  -- expert id of the tile's first row
    # mix_ref  : SMEM (n_row_tiles,) int32  -- 1 iff tile spans >1 expert
    # x_ref    : (ROW_TILE, D_pad)
    # eidv_ref : (ROW_TILE, 1) int32        -- per-row expert id (boundary tiles)
    # w_ref    : (3, D_pad, TILE_N)         -- all three experts, VMEM resident
    # b_ref    : (3, 1, TILE_N)
    # o_ref    : (ROW_TILE, TILE_N)
    i = pl.program_id(1)        # row-tile index (innermost grid axis)
    x = x_ref[...]

    @pl.when(mix_ref[i] == 0)
    def _uniform():
        e = eid_ref[i]
        acc = jnp.dot(x, w_ref[e], preferred_element_type=jnp.float32)
        o_ref[...] = (acc + b_ref[e].astype(jnp.float32)).astype(o_ref.dtype)

    @pl.when(mix_ref[i] != 0)
    def _mixed():
        eid_rows = eidv_ref[...]                       # (ROW_TILE, 1)
        acc = jnp.zeros(o_ref.shape, jnp.float32)
        for e in range(3):                             # at most a few such tiles
            ye = jnp.dot(x, w_ref[e], preferred_element_type=jnp.float32)
            ye = ye + b_ref[e].astype(jnp.float32)
            acc = acc + (eid_rows == e).astype(jnp.float32) * ye
        o_ref[...] = acc.astype(o_ref.dtype)


def multiway_linear(x, w_stacked, b_stacked, split1, split2, *,
                    row_tile=256, tile_n=None):
    """x: (B, T, D); w_stacked: (3, D, Dout); b_stacked: (3, Dout).

    Mirrors MultiwayNetwork.forward with an nn.Linear inner module:
      split x along dim=1 at [split1, split2, T-split1-split2], apply
      Linear A / B / C, concatenate along dim=1.
    split1/split2 must be static Python ints (routing table built at trace time).
    """
    B, T, D = x.shape
    nE, Dw, Dout = w_stacked.shape
    assert nE == 3 and Dw == D
    assert 0 <= split1 and 0 <= split2 and split1 + split2 <= T

    D_pad = _round_up(D, 128)
    Dout_pad = _round_up(Dout, 128)
    if tile_n is None:
        tile_n = next(t for t in (512, 256, 128) if Dout_pad % t == 0)
    assert tile_n % 128 == 0 and Dout_pad % tile_n == 0
    n_ntiles = Dout_pad // tile_n

    R = B * T
    R_pad = _round_up(R, row_tile)
    n_rtiles = R_pad // row_tile

    # Host-side routing table (split positions are static Python ints).
    rows = np.arange(R_pad)
    pos = rows % T                      # padded rows reuse the formula; discarded
    eid_rows_np = np.where(pos < split1, 0,
                           np.where(pos < split1 + split2, 1, 2)).astype(np.int32)
    eid_tiles = eid_rows_np.reshape(n_rtiles, row_tile)
    tile_eid = jnp.asarray(eid_tiles[:, 0], dtype=jnp.int32)
    tile_mixed = jnp.asarray(
        (eid_tiles != eid_tiles[:, :1]).any(axis=1).astype(np.int32))
    eidv = jnp.asarray(eid_rows_np.reshape(R_pad, 1))   # per-row ids for boundary tiles

    # Zero-pad to lane/sublane-friendly shapes (sliced off at the end).
    x2 = jnp.pad(x.reshape(R, D), ((0, R_pad - R), (0, D_pad - D)))
    w3 = jnp.pad(w_stacked, ((0, 0), (0, D_pad - D), (0, Dout_pad - Dout)))
    b3 = jnp.pad(b_stacked, ((0, 0), (0, Dout_pad - Dout))).reshape(3, 1, Dout_pad)

    itemsize = jnp.dtype(x.dtype).itemsize
    cost = pl.CostEstimate(
        flops=2 * R_pad * D_pad * Dout_pad,
        transcendentals=0,
        bytes_accessed=(x2.size * itemsize * n_ntiles
                        + w3.size * jnp.dtype(w3.dtype).itemsize
                        + R_pad * Dout_pad * itemsize))

    out = pl.pallas_call(
        _multiway_kernel,
        out_shape=jax.ShapeDtypeStruct((R_pad, Dout_pad), x.dtype),
        grid_spec=pltpu.PrefetchScalarGridSpec(
            num_scalar_prefetch=2,
            # Column tiles outer, row tiles inner -> weight block re-DMA'd only
            # when the column tile changes (once per j).
            grid=(n_ntiles, n_rtiles),
            in_specs=[
                pl.BlockSpec((row_tile, D_pad), lambda j, i, eid, mix: (i, 0)),
                pl.BlockSpec((row_tile, 1), lambda j, i, eid, mix: (i, 0)),
                pl.BlockSpec((3, D_pad, tile_n), lambda j, i, eid, mix: (0, 0, j)),
                pl.BlockSpec((3, 1, tile_n), lambda j, i, eid, mix: (0, 0, j)),
            ],
            out_specs=pl.BlockSpec((row_tile, tile_n),
                                   lambda j, i, eid, mix: (i, j)),
        ),
        compiler_params=pltpu.CompilerParams(
            dimension_semantics=("parallel", "parallel"),
            vmem_limit_bytes=48 * 1024 * 1024),
        cost_estimate=cost,
    )(tile_eid, tile_mixed, x2, eidv, w3, b3)

    return out[:R, :Dout].reshape(B, T, Dout)


if __name__ == "__main__":
    # Small but non-trivial shapes: non-128-multiple D/Dout (exercises padding),
    # non-tile-aligned splits and batch boundaries (exercises the masked
    # boundary-tile path) plus fully-uniform tiles (fast path), and >1 output
    # column tile (exercises weight residency per column tile).
    B, T, D, Dout = 2, 500, 96, 200
    split1, split2 = 200, 150          # third segment = 150

    key = jax.random.PRNGKey(0)
    kx, kw, kb = jax.random.split(key, 3)
    x = jax.random.normal(kx, (B, T, D), dtype=jnp.float32)
    # deterministic synthetic parameters for the three Linear copies (A, B, C)
    w = jax.random.normal(kw, (3, D, Dout), dtype=jnp.float32) * 0.05
    b = jax.random.normal(kb, (3, Dout), dtype=jnp.float32) * 0.05

    y = multiway_linear(x, w, b, split1, split2, row_tile=128, tile_n=128)
    y = jax.block_until_ready(y)

    # pure-JAX reference mirroring the PyTorch forward (split -> A/B/C -> cat)
    x1, x2_, x3 = x[:, :split1], x[:, split1:split1 + split2], x[:, split1 + split2:]
    ref = jnp.concatenate(
        [x1 @ w[0] + b[0], x2_ @ w[1] + b[1], x3 @ w[2] + b[2]], axis=1)
    assert jnp.allclose(y, ref, atol=1e-3, rtol=1e-3), \
        float(jnp.max(jnp.abs(y - ref)))

    print("KERNEL_OK")
</pallas_src>

<mosaic_0001>
module attributes {stable_mosaic.version = 11 : i64} {
  func.func @_multiway_kernel(%arg0: i32, %arg1: i32, %arg2: memref<8xi32, #tpu.memory_space<smem>>, %arg3: memref<8xi32, #tpu.memory_space<smem>>, %arg4: memref<128x128xf32, #tpu.memory_space<vmem>>, %arg5: memref<128x1xi32, #tpu.memory_space<vmem>>, %arg6: memref<3x128x128xf32, #tpu.memory_space<vmem>>, %arg7: memref<3x1x128xf32, #tpu.memory_space<vmem>>, %arg8: memref<128x128xf32, #tpu.memory_space<vmem>>) attributes {dimension_semantics = [#tpu.dimension_semantics<parallel>, #tpu.dimension_semantics<parallel>], iteration_bounds = array<i64: 2, 8>, scalar_prefetch = 2 : i64, scratch_operands = 0 : i64, tpu.core_type = #tpu.core_type<tc>, window_params = [{transform_indices = @transform_0, window_bounds = array<i64: 128, 128>}, {transform_indices = @transform_1, window_bounds = array<i64: 128, 1>}, {transform_indices = @transform_2, window_bounds = array<i64: 3, 128, 128>}, {transform_indices = @transform_3, window_bounds = array<i64: 3, 1, 128>}, {transform_indices = @transform_4, window_bounds = array<i64: 128, 128>}]} {
    %c0 = arith.constant 0 : index
    %c0_0 = arith.constant 0 : index
    %0 = vector.load %arg4[%c0, %c0_0] : memref<128x128xf32, #tpu.memory_space<vmem>>, vector<128x128xf32>
    %1 = arith.index_cast %arg1 : i32 to index
    %2 = memref.load %arg3[%1] : memref<8xi32, #tpu.memory_space<smem>>
    %c0_i32 = arith.constant 0 : i32
    %3 = arith.cmpi eq, %2, %c0_i32 : i32
    %4 = arith.extui %3 : i1 to i32
    %c0_i32_1 = arith.constant 0 : i32
    %5 = arith.cmpi ne, %4, %c0_i32_1 : i32
    scf.if %5 {
      %11 = arith.index_cast %arg1 : i32 to index
      %12 = memref.load %arg2[%11] : memref<8xi32, #tpu.memory_space<smem>>
      %13 = arith.index_cast %12 : i32 to index
      %c0_4 = arith.constant 0 : index
      %c0_5 = arith.constant 0 : index
      %14 = vector.load %arg6[%13, %c0_4, %c0_5] : memref<3x128x128xf32, #tpu.memory_space<vmem>>, vector<1x128x128xf32>
      %15 = vector.shape_cast %14 : vector<1x128x128xf32> to vector<128x128xf32>
      %cst = arith.constant dense<0.000000e+00> : vector<128x128xf32>
      %16 = tpu.matmul %0, %15, %cst {dimension_numbers = #tpu.dot_dimension_numbers<[1], [0], [0], [1], [0, 0, 1, 1], [], []>} : vector<128x128xf32>, vector<128x128xf32>, vector<128x128xf32> -> vector<128x128xf32>
      %17 = arith.index_cast %12 : i32 to index
      %c0_6 = arith.constant 0 : index
      %c0_7 = arith.constant 0 : index
      %18 = vector.load %arg7[%17, %c0_6, %c0_7] : memref<3x1x128xf32, #tpu.memory_space<vmem>>, vector<1x1x128xf32>
      %19 = vector.shape_cast %18 : vector<1x1x128xf32> to vector<1x128xf32>
      %20 = vector.broadcast %19 : vector<1x128xf32> to vector<128x128xf32>
      %21 = arith.addf %16, %20 : vector<128x128xf32>
      %c0_8 = arith.constant 0 : index
      %c0_9 = arith.constant 0 : index
      %22 = vector.load %arg8[%c0_8, %c0_9] : memref<128x128xf32, #tpu.memory_space<vmem>>, vector<128x128xf32>
      tpu.vector_store %arg8[%c0_8, %c0_9], %21 {strides = array<i32>} : memref<128x128xf32, #tpu.memory_space<vmem>>, vector<128x128xf32>,
    } else {
    }
    %6 = arith.index_cast %arg1 : i32 to index
    %7 = memref.load %arg3[%6] : memref<8xi32, #tpu.memory_space<smem>>
    %c0_i32_2 = arith.constant 0 : i32
    %8 = arith.cmpi ne, %7, %c0_i32_2 : i32
    %9 = arith.extui %8 : i1 to i32
    %c0_i32_3 = arith.constant 0 : i32
    %10 = arith.cmpi ne, %9, %c0_i32_3 : i32
    scf.if %10 {
      %c0_4 = arith.constant 0 : index
      %c0_5 = arith.constant 0 : index
      %11 = vector.load %arg5[%c0_4, %c0_5] : memref<128x1xi32, #tpu.memory_space<vmem>>, vector<128x1xi32>
      %cst = arith.constant 0.000000e+00 : f32
      %12 = vector.broadcast %cst : f32 to vector<128x128xf32>
      %c0_6 = arith.constant 0 : index
      %c0_7 = arith.constant 0 : index
      %c0_8 = arith.constant 0 : index
      %13 = vector.load %arg6[%c0_6, %c0_7, %c0_8] : memref<3x128x128xf32, #tpu.memory_space<vmem>>, vector<1x128x128xf32>
      %14 = vector.shape_cast %13 : vector<1x128x128xf32> to vector<128x128xf32>
      %cst_9 = arith.constant dense<0.000000e+00> : vector<128x128xf32>
      %15 = tpu.matmul %0, %14, %cst_9 {dimension_numbers = #tpu.dot_dimension_numbers<[1], [0], [0], [1], [0, 0, 1, 1], [], []>} : vector<128x128xf32>, vector<128x128xf32>, vector<128x128xf32> -> vector<128x128xf32>
      %c0_10 = arith.constant 0 : index
      %c0_11 = arith.constant 0 : index
      %c0_12 = arith.constant 0 : index
      %16 = vector.load %arg7[%c0_10, %c0_11, %c0_12] : memref<3x1x128xf32, #tpu.memory_space<vmem>>, vector<1x1x128xf32>
      %17 = vector.shape_cast %16 : vector<1x1x128xf32> to vector<1x128xf32>
      %18 = vector.broadcast %17 : vector<1x128xf32> to vector<128x128xf32>
      %19 = arith.addf %15, %18 : vector<128x128xf32>
      %c0_i32_13 = arith.constant 0 : i32
      %20 = vector.broadcast %c0_i32_13 : i32 to vector<128x1xi32>
      %21 = arith.cmpi eq, %11, %20 : vector<128x1xi32>
      %22 = arith.extui %21 : vector<128x1xi1> to vector<128x1xi32>
      %23 = arith.sitofp %22 : vector<128x1xi32> to vector<128x1xf32>
      %24 = vector.broadcast %23 : vector<128x1xf32> to vector<128x128xf32>
      %25 = arith.mulf %24, %19 : vector<128x128xf32>
      %26 = arith.addf %12, %25 : vector<128x128xf32>
      %c1 = arith.constant 1 : index
      %c0_14 = arith.constant 0 : index
      %c0_15 = arith.constant 0 : index
      %27 = vector.load %arg6[%c1, %c0_14, %c0_15] : memref<3x128x128xf32, #tpu.memory_space<vmem>>, vector<1x128x128xf32>
      %28 = vector.shape_cast %27 : vector<1x128x128xf32> to vector<128x128xf32>
      %cst_16 = arith.constant dense<0.000000e+00> : vector<128x128xf32>
      %29 = tpu.matmul %0, %28, %cst_16 {dimension_numbers = #tpu.dot_dimension_numbers<[1], [0], [0], [1], [0, 0, 1, 1], [], []>} : vector<128x128xf32>, vector<128x128xf32>, vector<128x128xf32> -> vector<128x128xf32>
      %c1_17 = arith.constant 1 : index
      %c0_18 = arith.constant 0 : index
      %c0_19 = arith.constant 0 : index
      %30 = vector.load %arg7[%c1_17, %c0_18, %c0_19] : memref<3x1x128xf32, #tpu.memory_space<vmem>>, vector<1x1x128xf32>
      %31 = vector.shape_cast %30 : vector<1x1x128xf32> to vector<1x128xf32>
      %32 = vector.broadcast %31 : vector<1x128xf32> to vector<128x128xf32>
      %33 = arith.addf %29, %32 : vector<128x128xf32>
      %c1_i32 = arith.constant 1 : i32
      %34 = vector.broadcast %c1_i32 : i32 to vector<128x1xi32>
      %35 = arith.cmpi eq, %11, %34 : vector<128x1xi32>
      %36 = arith.extui %35 : vector<128x1xi1> to vector<128x1xi32>
      %37 = arith.sitofp %36 : vector<128x1xi32> to vector<128x1xf32>
      %38 = vector.broadcast %37 : vector<128x1xf32> to vector<128x128xf32>
      %39 = arith.mulf %38, %33 : vector<128x128xf32>
      %40 = arith.addf %26, %39 : vector<128x128xf32>
      %c2 = arith.constant 2 : index
      %c0_20 = arith.constant 0 : index
      %c0_21 = arith.constant 0 : index
      %41 = vector.load %arg6[%c2, %c0_20, %c0_21] : memref<3x128x128xf32, #tpu.memory_space<vmem>>, vector<1x128x128xf32>
      %42 = vector.shape_cast %41 : vector<1x128x128xf32> to vector<128x128xf32>
      %cst_22 = arith.constant dense<0.000000e+00> : vector<128x128xf32>
      %43 = tpu.matmul %0, %42, %cst_22 {dimension_numbers = #tpu.dot_dimension_numbers<[1], [0], [0], [1], [0, 0, 1, 1], [], []>} : vector<128x128xf32>, vector<128x128xf32>, vector<128x128xf32> -> vector<128x128xf32>
      %c2_23 = arith.constant 2 : index
      %c0_24 = arith.constant 0 : index
      %c0_25 = arith.constant 0 : index
      %44 = vector.load %arg7[%c2_23, %c0_24, %c0_25] : memref<3x1x128xf32, #tpu.memory_space<vmem>>, vector<1x1x128xf32>
      %45 = vector.shape_cast %44 : vector<1x1x128xf32> to vector<1x128xf32>
      %46 = vector.broadcast %45 : vector<1x128xf32> to vector<128x128xf32>
      %47 = arith.addf %43, %46 : vector<128x128xf32>
      %c2_i32 = arith.constant 2 : i32
      %48 = vector.broadcast %c2_i32 : i32 to vector<128x1xi32>
      %49 = arith.cmpi eq, %11, %48 : vector<128x1xi32>
      %50 = arith.extui %49 : vector<128x1xi1> to vector<128x1xi32>
      %51 = arith.sitofp %50 : vector<128x1xi32> to vector<128x1xf32>
      %52 = vector.broadcast %51 : vector<128x1xf32> to vector<128x128xf32>
      %53 = arith.mulf %52, %47 : vector<128x128xf32>
      %54 = arith.addf %40, %53 : vector<128x128xf32>
      %c0_26 = arith.constant 0 : index
      %c0_27 = arith.constant 0 : index
      %55 = vector.load %arg8[%c0_26, %c0_27] : memref<128x128xf32, #tpu.memory_space<vmem>>, vector<128x128xf32>
      tpu.vector_store %arg8[%c0_26, %c0_27], %54 {strides = array<i32>} : memref<128x128xf32, #tpu.memory_space<vmem>>, vector<128x128xf32>,
    } else {
    }
    return
  }
  func.func @transform_0(%arg0: i32, %arg1: i32, %arg2: memref<8xi32, #tpu.memory_space<smem>>, %arg3: memref<8xi32, #tpu.memory_space<smem>>) -> (i32, i32) {
    %c0_i32 = arith.constant 0 : i32
    %c0_i32_0 = arith.constant 0 : i32
    return %arg1, %c0_i32 : i32, i32
  }
  func.func @transform_1(%arg0: i32, %arg1: i32, %arg2: memref<8xi32, #tpu.memory_space<smem>>, %arg3: memref<8xi32, #tpu.memory_space<smem>>) -> (i32, i32) {
    %c0_i32 = arith.constant 0 : i32
    %c0_i32_0 = arith.constant 0 : i32
    return %arg1, %c0_i32 : i32, i32
  }
  func.func @transform_2(%arg0: i32, %arg1: i32, %arg2: memref<8xi32, #tpu.memory_space<smem>>, %arg3: memref<8xi32, #tpu.memory_space<smem>>) -> (i32, i32, i32) {
    %c0_i32 = arith.constant 0 : i32
    %c0_i32_0 = arith.constant 0 : i32
    %c0_i32_1 = arith.constant 0 : i32
    return %c0_i32, %c0_i32_0, %arg0 : i32, i32, i32
  }
  func.func @transform_3(%arg0: i32, %arg1: i32, %arg2: memref<8xi32, #tpu.memory_space<smem>>, %arg3: memref<8xi32, #tpu.memory_space<smem>>) -> (i32, i32, i32) {
    %c0_i32 = arith.constant 0 : i32
    %c0_i32_0 = arith.constant 0 : i32
    %c0_i32_1 = arith.constant 0 : i32
    return %c0_i32, %c0_i32_0, %arg0 : i32, i32, i32
  }
  func.func @transform_4(%arg0: i32, %arg1: i32, %arg2: memref<8xi32, #tpu.memory_space<smem>>, %arg3: memref<8xi32, #tpu.memory_space<smem>>) -> (i32, i32) {
    %c0_i32 = arith.constant 0 : i32
    return %arg1, %arg0 : i32, i32
  }
}

</mosaic_0001>

<bundles_post_ra>
// kernel: tpu_custom_call.1
= control target key start
LH: loop header
LB: loop body
LE: loop exit
PB: predicated region body
PF: predicated region fallthrough
CT: control target
= control target key end

     0   :  { %s3585_s0 = inlined_call_operand.vmem [shape: s32[8], index: 0, kind: input, shape index: {}]   ;;  %s3586_s2 = inlined_call_operand.vmem [shape: f32[1024,128], index: 2, kind: input, shape index: {}]   ;;  %s3587_s3 = inlined_call_operand.vmem [shape: s32[1024,1], index: 3, kind: input, shape index: {}]   ;;  %s3588_s4 = inlined_call_operand.hbm [shape: f32[3,128,256], index: 4, kind: input, shape index: {}]   ;;  %s3589_s5 = inlined_call_operand.vmem [shape: f32[3,1,256], index: 5, kind: input, shape index: {}]   ;;  %s3590_s6 = inlined_call_operand.hbm [shape: f32[1024,256], index: 6, kind: output, shape index: {}]   ;;  %s3591_s1 = inlined_call_operand.vmem [shape: s32[8], index: 1, kind: input, shape index: {}]  }
   0x1   :  { %s11_s23 = sshll.u32 %s3585_s0, 4  ;;  %s15_s26 = sshll.u32 %s3591_s1, 4  ;;  %s12_s23 = int_to_ptr.vmem [resolvable:$true] %s11_s23  ;;  %s16_s26 = int_to_ptr.vmem [resolvable:$true] %s15_s26 }
   0x2   :  { %s2484_s27 = scalar_lea.vmem %s12_s23, 16  ;;  %p2489_p1 = scmp.lt.s32.totalorder %s12_s23, %s12_s23 }
   0x3   :  { %p2485_p0 = scmp.ne.s32.totalorder %s12_s23, %s2484_s27  ;;  %p2490_p2 = scmp.lt.s32.totalorder %s2484_s27, %s2484_s27 }
   0x5   :  { %p2491_p3 = por %p2490_p2, %p2489_p1 }
   0x7   :  { %p2492_p4 = pnand %p2491_p3, %p2485_p0 }
   0x9   :  { %2495 = shalt.err (!%p2492_p4)  }
   0xa   :  { %s2658_s28 = smov [#allocation3]   ;;  %s2496_s29 = scalar_lea.vmem %s16_s26, 16 }
   0xb   :  { %14 = dma.vmem_to_smem %s12_s23, 16, %s2658_s28, [#allocation2] }
   0xc   :  { %p2497_p5 = scmp.ne.s32.totalorder %s16_s26, %s2496_s29  ;;  %p2501_p6 = scmp.lt.s32.totalorder %s16_s26, %s16_s26 }
   0xd   :  { %p2502_p7 = scmp.lt.s32.totalorder %s2496_s29, %s2496_s29 }
   0xf   :  { %p2503_p8 = por %p2502_p7, %p2501_p6 }
  0x11   :  { %p2504_p9 = pnand %p2503_p8, %p2497_p5 }
  0x13   :  { %2507 = shalt.err (!%p2504_p9)  }
  0x14   :  { %s2659_s0 = smov [#allocation4]  }
  0x15   :  { %18 = dma.vmem_to_smem %s16_s26, 16, %s2659_s0, [#allocation2] }
  0x16   :  { %2604 = dma.done.wait [#allocation2], 32 }
  0x17   :  { %2605 = vsyncadd [#allocation2], 4294967264 }
  0x18   :  { %20 = sfence }
  0x19   :  { %21 = vsyncpa [#allocation6], 0 }
  0x1a   :  { %23 = vsyncpa [#allocation6 + $0x1], 0 }
  0x1b   :  { %24 = vsyncpa [#allocation7], 0 }
  0x1c   :  { %26 = vsyncpa [#allocation7 + $0x1], 0  ;;  %s2711_s1 = smov 0   ;;  %s2713_s30 = smov 0  }
  0x1d   :  { %s2715_s7 = smov 0   ;;  %s2717_s8 = smov 0  }
  0x1e   :  { %s2719_s9 = smov 0   ;;  %s2721_s10 = smov 0  }
  0x1f   :  { %s2723_s11 = smov 0   ;;  %s2725_s12 = smov 0  }
  0x20   :  { %s2727_s13 = smov 0   ;;  %s2729_s14 = smov 0  }
  0x21   :  { %s2731_s15 = smov 0  }
  0x22 LB: > { %3596 = sst [smem:[#allocation13_spill]] %s2636_s10  ;;  %s1728_s16 = sadd.s32 4294967295, %s2656_s15   ;;  %s2656_s15 = sphi %s2731_s15, %s32_s15   ;;  %s2652_s14 = sphi %s2729_s14, %s3644_s14   ;;  %s2648_s13 = sphi %s2727_s13, %s3636_s13   ;;  %s2644_s12 = sphi %s2725_s12, %s3643_s12   ;;  %s2640_s11 = sphi %s2723_s11, %s3635_s11   ;;  %s2636_s10 = sphi %s2721_s10, %s3634_s10   ;;  %s2632_s9 = sphi %s2719_s9, %s3642_s9   ;;  %s2628_s8 = sphi %s2717_s8, %s3641_s8   ;;  %s2624_s7 = sphi %s2715_s7, %s3640_s7   ;;  %s2620_s30 = sphi %s2713_s30, %s3639_s30   ;;  %s2616_s1 = sphi %s2711_s1, %s3638_s1  }
  0x23   : > { %3597 = sst [smem:[#allocation14_spill]] %s2648_s13  ;;  %s1729_s17 = sadd.s32 4294967294, %s2656_s15  }
  0x24   : > { %s41_s18 = sadd.s32 1, %s2648_s13  ;;  %s44_s19 = sadd.s32 1, %s2652_s14 }
  0x25   : > { %p42_p10 = scmp.ge.s32.totalorder %s41_s18, 8  ;;  %s103_s20 = sadd.s32 1, %s2636_s10 }
  0x26   : > { %p110_p11 = scmp.ne.s32.totalorder %s2636_s10, %s2632_s9  ;;  %p111_p12 = scmp.eq.s32.totalorder %s2656_s15, 0 }
  0x27   : > { %s3646_s18 = smov (%p42_p10, %s41_s18), 0  ;;  %s3648_s19 = smov (!%p42_p10, %s44_s19), %s2652_s14 }
  0x28   : > { %3598 = sst [smem:[#allocation15_spill]] %s3646_s18  ;;  %p2775_p13 = por %p111_p12, %p110_p11 }
  0x29   : > { %p116_p0 = scmp.ne.s32.totalorder %s2632_s9, %s2628_s8  ;;  %p46_p1 = scmp.ge.s32.totalorder %s3648_s19, 2 }
  0x2a   : > { %p117_p2 = scmp.eq.s32.totalorder %s1728_s16, 0  ;;  %s152_s22 = ssub.s32 %s2648_s13, %s3646_s18 }
  0x2b   : > { %s157_s23 = sadd.s32 1, %s2624_s7  ;;  %s3650_s19 = smov (%p46_p1, %s3648_s19), 0 }
  0x2c   : > { %3600 = sst [smem:[#allocation16_spill]] %s3650_s19  ;;  %p2785_p3 = por %p117_p2, %p116_p0 }
  0x2d   : > { %p167_p4 = scmp.ne.s32.totalorder %s2624_s7, %s2620_s30  ;;  %s100_s25 = ssub.s32 %s2652_s14, %s3650_s19 }
  0x2e   : > { %p168_p5 = scmp.eq.s32.totalorder %s1728_s16, 15  ;;  %p101_p6 = scmp.eq.s32.totalorder %s100_s25, 0 }
  0x2f   : > { %s154_s26 = sor.u32 %s152_s22, %s100_s25  ;;  %p173_p9 = scmp.ne.s32.totalorder %s2620_s30, %s2616_s1 }
  0x30   : > { %p155_p7 = scmp.eq.s32.totalorder %s154_s26, 0  ;;  %p2793_p8 = por %p168_p5, %p167_p4 }
  0x31   : > { %s2798_s28 = scalar_select %p101_p6, %s2636_s10, %s103_s20  }
  0x32   : > { %s2801_s29 = scalar_select %p155_p7, %s2624_s7, %s157_s23  }
  0x33   : > { %3603 = sst [smem:[#allocation17_spill]] %s2798_s28  ;;  %p174_p10 = scmp.eq.s32.totalorder %s1729_s17, 15 }
  0x34   : > { %p1731_p12 = scmp.ge.s32.totalorder %s2656_s15, 16 }
  0x35   : > { %p2805_p11 = por %p174_p10, %p173_p9  ;;  %s2811_s8 = sand.u32 (!%p1731_p12), 1, %s2636_s10  }
  0x36   : > { %190 = sbr.rel (%p1731_p12) target bundleno = 77 (0x4d), region = 16  ;;  %s1732_s16 = sshll.u32 (!%p1731_p12), %s2652_s14, 7 }
  0x37   : > { %s2251_s20 = smul.u32 (!%p1731_p12), 384, %s2811_s8  ;;  %s221_s17 = scalar_lea.hbm (!%p1731_p12), %s3588_s4, %s1732_s16 }
  0x38   : > { %s213_s19 = scalar_lea.sflag (!%p1731_p12), [#allocation6], %s2811_s8  ;;  %s2660_s13 = smov (!%p1731_p12), [#allocation5]  }
  0x39   : > { %s216_s25 = scalar_lea.vmem (!%p1731_p12), [#allocation5], %s2251_s20  ;;  %s2524_s28 = sshll.u32 (!%p1731_p12), %s2660_s13, 4  ;;  %s2525_s28 = int_to_ptr.vmem [resolvable:$false] %s2524_s28 }
  0x3a   : > { %s222_s26 = sshll.u32 (!%p1731_p12), %s216_s25, 4  ;;  %s2526_s10 = scalar_lea.vmem (!%p1731_p12), %s2525_s28, 12288  ;;  %s223_s26 = int_to_ptr.vmem [resolvable:$true] %s222_s26 }
  0x3b   : > { %s2520_s18 = scalar_lea.vmem %s223_s26, 6144  ;;  %p2527_p4 = scmp.lt.s32.totalorder %s223_s26, %s2525_s28 }
  0x3c   : > { %p2521_p0 = scmp.ne.s32.totalorder %s223_s26, %s2520_s18  ;;  %p2528_p5 = scmp.lt.s32.totalorder %s2526_s10, %s2520_s18 }
  0x3e   : > { %p2522_p1 = pnand %p2521_p0, %p2775_p13  ;;  %p2529_p6 = por %p2528_p5, %p2527_p4 }
  0x40   : > { %p2523_p2 = pneg %p2522_p1 }
  0x42   : > { %p2530_p7 = pnand %p2529_p6, %p2523_p2 }
  0x44   : > { %2533 = shalt.err (!%p2530_p7)
}
  0x45   : > { %s2661_s22 = smov 256   ;;  %s2662_s16 = smov 128  }
  0x46   : > { %s2663_s20 = smov 8   ;;  %231 = sbr.rel (!%p2775_p13) target bundleno = 77 (0x4d), region = 32 }
  0x47   : > { %2255 = dma.hbm_to_vmem [thread:$0]  (%p2775_p13), %s221_s17, 6144, %s223_s26, %s213_s19, %s2661_s22, %s2662_s16, %s2663_s20  }
  0x48   : > { %s2252_s23 = smul.u32 (%p2775_p13), 3, %s2811_s8  ;;  %s236_s28 = scalar_lea.vmem (%p2775_p13), %s3589_s5, %s2652_s14 }
  0x49   : > { %v253_v0 = vld [vmem:[%s236_s28] sm:$0x1] (%p2775_p13)  ;;  %v255_v1 = vld [vmem:[%s236_s28 + $0x2] sm:$0x1] (%p2775_p13)  ;;  %v257_v2 = vld [vmem:[%s236_s28 + $0x4] sm:$0x1] (%p2775_p13) }
  0x4a   : > { %s235_s10 = scalar_lea.vmem (%p2775_p13), [#allocation8], %s2252_s23 }
  0x4b   : > { %254 = vst [vmem:[%s235_s10] sm:$0x1] %v253_v0  ;;  %256 = vst [vmem:[%s235_s10 + $0x1] sm:$0x1] %v255_v1 }
  0x4c   : > { %258 = vst [vmem:[%s235_s10 + $0x2] sm:$0x1] %v257_v2 }
  0x4d PF: > { %p1733_p9 = scmp.ge.s32.totalorder %s2656_s15, 1  ;;  %p279_p13 = scmp.lt.s32.totalorder %s2656_s15, 17 }
  0x4f   : > { %p280_p10 = pnand %p1733_p9, %p279_p13 }
  0x50   : > { %s2833_s18 = sand.u32 (!%p280_p10), 1, %s2632_s9  }
  0x51   : > { %283 = sbr.rel (%p280_p10) target bundleno = 685 (0x2ad), region = 66  ;;  %s286_s21 = scalar_lea.sflag (!%p280_p10), [#allocation6], %s2833_s18 }
  0x52   : > { %s2253_s19 = smul.u32 (!%p280_p10), 384, %s2833_s18 }
  0x54   : > { %s2837_s8 = scalar_lea.vmem (!%p280_p10), [#allocation5], %s2253_s19 }
  0x56   : > { %2607 = dma.done.wait (%p2785_p3), %s286_s21, 6144  }
  0x57   : > { %2609 = vsyncadd (%p2785_p3), %s286_s21, 4294961152  ;;  %s1735_s17 = sshll.u32 %s2640_s11, 4  ;;  %s2254_s26 = smul.u32 3, %s2833_s18 }
  0x58   : > { %p336_p12 = scmp.lt.s32.totalorder %s1735_s17, 127  ;;  %s364_s22 = sld [smem:[#allocation4 + %s2640_s11]] }
  0x59   : > { %s332_s16 = sand.u32 1, %s2620_s30   ;;  %s2889_s18 = scalar_lea.vmem [#allocation8], %s2254_s26 }
  0x5a   : > { %s3652_s17 = smov (!%p336_p12, %s1735_s17), 127  ;;  %s1734_s20 = sshll.u32 %s332_s16, 7 }
  0x5b   : > { %s1736_s23 = sshll.u32 %s3652_s17, 3  ;;  %s2891_s21 = scalar_lea.vmem [#allocation9], %s1734_s20 }
  0x5c   : > { %s339_s28 = scalar_lea.vmem %s3586_s2, %s1736_s23  ;;  %s2855_s19 = scalar_lea.vmem %s3587_s3, %s1736_s23 }
  0x5d   : > { %v2857_v3 = vld [vmem:[%s339_s28] sm:$0xff]  ;;  %v2859_v4 = vld [vmem:[%s339_s28 + $0x8] sm:$0xff]  ;;  %v2861_v5 = vld [vmem:[%s339_s28 + $0x10] sm:$0xff] }
  0x5e   : > { %v2863_v6 = vld [vmem:[%s339_s28 + $0x18] sm:$0xff]  ;;  %v2865_v7 = vld [vmem:[%s339_s28 + $0x20] sm:$0xff]  ;;  %v2867_v8 = vld [vmem:[%s339_s28 + $0x28] sm:$0xff]  ;;  %p1739_p3 = scmp.ne.s32.totalorder %s364_s22, 0 }
  0x5f   : > { %v2869_v9 = vld [vmem:[%s339_s28 + $0x30] sm:$0xff]  ;;  %v2871_v10 = vld [vmem:[%s339_s28 + $0x38] sm:$0xff]  ;;  %v2873_v11 = vld [vmem:[%s339_s28 + $0x40] sm:$0xff]  ;;  %s2894_s17 = sld [smem:[#allocation3 + %s2640_s11]] (!%p1739_p3) }
  0x60   : > { %v2875_v12 = vld [vmem:[%s339_s28 + $0x48] sm:$0xff]  ;;  %v2877_v13 = vld [vmem:[%s339_s28 + $0x50] sm:$0xff]  ;;  %v2879_v14 = vld [vmem:[%s339_s28 + $0x58] sm:$0xff]  ;;  %368 = sbr.rel (%p1739_p3) target bundleno = 346 (0x15a), region = 78 }
  0x61   : > { %v2881_v15 = vld [vmem:[%s339_s28 + $0x60] sm:$0xff]  ;;  %v2883_v16 = vld [vmem:[%s339_s28 + $0x68] sm:$0xff]  ;;  %v2885_v17 = vld [vmem:[%s339_s28 + $0x70] sm:$0xff] }
  0x62   : > { %v2887_v18 = vld [vmem:[%s339_s28 + $0x78] sm:$0xff] }
  0x65   : > { %1995 = vmatprep.mubr.f32.mxu0 %v2857_v3  ;;  %2007 = vmatprep.mubr.f32.mxu1 %v2873_v11  ;;  %s1740_s23 = sshll.u32 %s2894_s17, 7  ;;  %s388_s26 = scalar_lea.vmem %s2889_s18, %s2894_s17 [#allocation8] }
  0x66   : > { %s2900_s13 = scalar_lea.vmem %s2837_s8, %s1740_s23 [#allocation5]  ;;  %v1741_v35 = vld [vmem:[%s388_s26] ss:$0 sm:$0xff] }
  0x67   : > { %v387_v19 = vld [vmem:[%s2900_s13 + $0x78] sm:$0xff]  ;;  %v386_v20 = vld [vmem:[%s2900_s13 + $0x70] sm:$0xff]  ;;  %v385_v21 = vld [vmem:[%s2900_s13 + $0x68] sm:$0xff] }
  0x68   : > { %1963 = vmatprep.subr.mxu0 %v387_v19  ;;  %2187 = vmatprep.subr.mxu1 %v387_v19  ;;  %v384_v22 = vld [vmem:[%s2900_s13 + $0x60] sm:$0xff]  ;;  %v383_v23 = vld [vmem:[%s2900_s13 + $0x58] sm:$0xff]  ;;  %v382_v24 = vld [vmem:[%s2900_s13 + $0x50] sm:$0xff] }
  0x69   : > { %1964 = vmatpush3.msra.mxu0 %v387_v19  ;;  %2203 = vmatpush3.msra.mxu1 %v387_v19  ;;  %v381_v25 = vld [vmem:[%s2900_s13 + $0x48] sm:$0xff]  ;;  %v380_v26 = vld [vmem:[%s2900_s13 + $0x40] sm:$0xff]  ;;  %v379_v27 = vld [vmem:[%s2900_s13 + $0x38] sm:$0xff] }
  0x6a   : > { %1965 = vmatprep.subr.mxu0 %v386_v20  ;;  %2188 = vmatprep.subr.mxu1 %v386_v20  ;;  %v378_v28 = vld [vmem:[%s2900_s13 + $0x30] sm:$0xff]  ;;  %v377_v29 = vld [vmem:[%s2900_s13 + $0x28] sm:$0xff]  ;;  %v376_v30 = vld [vmem:[%s2900_s13 + $0x20] sm:$0xff] }
  0x6b   : > { %1966 = vmatpush3.msra.mxu0 %v386_v20  ;;  %2204 = vmatpush3.msra.mxu1 %v386_v20  ;;  %v375_v31 = vld [vmem:[%s2900_s13 + $0x18] sm:$0xff]  ;;  %v374_v32 = vld [vmem:[%s2900_s13 + $0x10] sm:$0xff]  ;;  %v373_v33 = vld [vmem:[%s2900_s13 + $0x8] sm:$0xff] }
  0x6c   : > { %1967 = vmatprep.subr.mxu0 %v385_v21  ;;  %2189 = vmatprep.subr.mxu1 %v385_v21  ;;  %v372_v34 = vld [vmem:[%s2900_s13] sm:$0xff] }
  0x6d   : > { %1968 = vmatpush3.msra.mxu0 %v385_v21  ;;  %2205 = vmatpush3.msra.mxu1 %v385_v21 }
  0x6e   : > { %1969 = vmatprep.subr.mxu0 %v384_v22  ;;  %2190 = vmatprep.subr.mxu1 %v384_v22 }
  0x6f   : > { %1970 = vmatpush3.msra.mxu0 %v384_v22  ;;  %2206 = vmatpush3.msra.mxu1 %v384_v22 }
  0x70   : > { %1971 = vmatprep.subr.mxu0 %v383_v23  ;;  %2191 = vmatprep.subr.mxu1 %v383_v23 }
  0x71   : > { %1972 = vmatpush3.msra.mxu0 %v383_v23  ;;  %2207 = vmatpush3.msra.mxu1 %v383_v23 }
  0x72   : > { %1973 = vmatprep.subr.mxu0 %v382_v24  ;;  %2192 = vmatprep.subr.mxu1 %v382_v24 }
  0x73   : > { %1974 = vmatpush3.msra.mxu0 %v382_v24  ;;  %2208 = vmatpush3.msra.mxu1 %v382_v24 }
  0x74   : > { %1975 = vmatprep.subr.mxu0 %v381_v25  ;;  %2193 = vmatprep.subr.mxu1 %v381_v25 }
  0x75   : > { %1976 = vmatpush3.msra.mxu0 %v381_v25  ;;  %2209 = vmatpush3.msra.mxu1 %v381_v25 }
  0x76   : > { %1977 = vmatprep.subr.mxu0 %v380_v26  ;;  %2194 = vmatprep.subr.mxu1 %v380_v26 }
  0x77   : > { %1978 = vmatpush3.msra.mxu0 %v380_v26  ;;  %2210 = vmatpush3.msra.mxu1 %v380_v26 }
  0x78   : > { %1979 = vmatprep.subr.mxu0 %v379_v27  ;;  %2195 = vmatprep.subr.mxu1 %v379_v27 }
  0x79   : > { %1980 = vmatpush3.msra.mxu0 %v379_v27  ;;  %2211 = vmatpush3.msra.mxu1 %v379_v27 }
  0x7a   : > { %1981 = vmatprep.subr.mxu0 %v378_v28  ;;  %2196 = vmatprep.subr.mxu1 %v378_v28 }
  0x7b   : > { %1982 = vmatpush3.msra.mxu0 %v378_v28  ;;  %2212 = vmatpush3.msra.mxu1 %v378_v28 }
  0x7c   : > { %1983 = vmatprep.subr.mxu0 %v377_v29  ;;  %2197 = vmatprep.subr.mxu1 %v377_v29 }
  0x7d   : > { %1984 = vmatpush3.msra.mxu0 %v377_v29  ;;  %2213 = vmatpush3.msra.mxu1 %v377_v29 }
  0x7e   : > { %1985 = vmatprep.subr.mxu0 %v376_v30  ;;  %2198 = vmatprep.subr.mxu1 %v376_v30 }
  0x7f   : > { %1986 = vmatpush3.msra.mxu0 %v376_v30  ;;  %2214 = vmatpush3.msra.mxu1 %v376_v30 }
  0x80   : > { %1987 = vmatprep.subr.mxu0 %v375_v31  ;;  %2199 = vmatprep.subr.mxu1 %v375_v31 }
  0x81   : > { %1988 = vmatpush3.msra.mxu0 %v375_v31  ;;  %2215 = vmatpush3.msra.mxu1 %v375_v31 }
  0x82   : > { %1989 = vmatprep.subr.mxu0 %v374_v32  ;;  %2200 = vmatprep.subr.mxu1 %v374_v32 }
  0x83   : > { %1990 = vmatpush3.msra.mxu0 %v374_v32  ;;  %2216 = vmatpush3.msra.mxu1 %v374_v32 }
  0x84   : > { %1991 = vmatprep.subr.mxu0 %v373_v33  ;;  %2201 = vmatprep.subr.mxu1 %v373_v33 }
  0x85   : > { %1992 = vmatpush3.msra.mxu0 %v373_v33  ;;  %2217 = vmatpush3.msra.mxu1 %v373_v33 }
  0x86   : > { %1993 = vmatprep.subr.mxu0 %v372_v34  ;;  %2202 = vmatprep.subr.mxu1 %v372_v34 }
  0x87   : > { %1994 = vmatpush3.msra.mxu0 %v372_v34  ;;  %2218 = vmatpush3.msra.mxu1 %v372_v34 }
  0x88   : > { %1996 = vmatmul.mubr.f32.vlgmr.msra.gmra.mxu0 %v2859_v4  ;;  %2008 = vmatmul.mubr.f32.vlgmr.msra.gmra.mxu1 %v2875_v12 }
  0x89   : > { %1998 = vmatprep.mubr.f32.mxu0 %v2861_v5  ;;  %2010 = vmatprep.mubr.f32.mxu1 %v2877_v13 }
  0x8c   : > { %1999 = vmatmul.mubr.f32.gmra.mxu0 %v2863_v6  ;;  %2011 = vmatmul.mubr.f32.gmra.mxu1 %v2879_v14 }
  0x8d   : > { %2001 = vmatprep.mubr.f32.mxu0 %v2865_v7  ;;  %2013 = vmatprep.mubr.f32.mxu1 %v2881_v15 }
  0x90   : > { %2002 = vmatmul.mubr.f32.gmra.mxu0 %v2867_v8  ;;  %2014 = vmatmul.mubr.f32.gmra.mxu1 %v2883_v16 }
  0x91   : > { %2004 = vmatprep.mubr.f32.mxu0 %v2869_v9  ;;  %2016 = vmatprep.mubr.f32.mxu1 %v2885_v17 }
  0x94   : > { %2005 = vmatmul.mubr.f32.gmra.mxu0 %v2871_v10  ;;  %2017 = vmatmul.mubr.f32.gmra.mxu1 %v2887_v18 }
 0x148   : > { %v1997_v36 = vpop.f32.mrf.mxu0  ;;  %v2009_v37 = vpop.f32.mrf.mxu1 }
 0x149   : > { %v468_v38 = vadd.f32 %v1997_v36, %v1741_v35  ;;  %v508_v39 = vadd.f32 %v2009_v37, %v1741_v35 }
 0x14a   : > { %v462_v40 = vpop.f32.mrf.mxu0  ;;  %v502_v41 = vpop.f32.mrf.mxu1 }
 0x14b   : > { %542 = vst [vmem:[%s2891_s21 + $0x8] sm:$0xff] %v468_v38  ;;  %550 = vst [vmem:[%s2891_s21 + $0x48] sm:$0xff] %v508_v39  ;;  %v463_v42 = vadd.f32 %v1741_v35, %v462_v40  ;;  %v503_v43 = vadd.f32 %v1741_v35, %v502_v41 }
 0x14c   : > { %v2000_v44 = vpop.f32.mrf.mxu0  ;;  %v2012_v45 = vpop.f32.mrf.mxu1 }
 0x14d   : > { %541 = vst [vmem:[%s2891_s21] sm:$0xff] %v463_v42  ;;  %549 = vst [vmem:[%s2891_s21 + $0x40] sm:$0xff] %v503_v43  ;;  %v478_v46 = vadd.f32 %v2000_v44, %v1741_v35  ;;  %v518_v47 = vadd.f32 %v2012_v45, %v1741_v35 }
 0x14e   : > { %v472_v48 = vpop.f32.mrf.mxu0  ;;  %v512_v49 = vpop.f32.mrf.mxu1 }
 0x14f   : > { %544 = vst [vmem:[%s2891_s21 + $0x18] sm:$0xff] %v478_v46  ;;  %552 = vst [vmem:[%s2891_s21 + $0x58] sm:$0xff] %v518_v47  ;;  %v473_v50 = vadd.f32 %v1741_v35, %v472_v48  ;;  %v513_v51 = vadd.f32 %v1741_v35, %v512_v49 }
 0x150   : > { %v2003_v52 = vpop.f32.mrf.mxu0  ;;  %v2015_v53 = vpop.f32.mrf.mxu1 }
 0x151   : > { %543 = vst [vmem:[%s2891_s21 + $0x10] sm:$0xff] %v473_v50  ;;  %551 = vst [vmem:[%s2891_s21 + $0x50] sm:$0xff] %v513_v51  ;;  %v488_v54 = vadd.f32 %v2003_v52, %v1741_v35  ;;  %v528_v55 = vadd.f32 %v2015_v53, %v1741_v35 }
 0x152   : > { %v482_v56 = vpop.f32.mrf.mxu0  ;;  %v522_v57 = vpop.f32.mrf.mxu1 }
 0x153   : > { %546 = vst [vmem:[%s2891_s21 + $0x28] sm:$0xff] %v488_v54  ;;  %554 = vst [vmem:[%s2891_s21 + $0x68] sm:$0xff] %v528_v55  ;;  %v483_v58 = vadd.f32 %v1741_v35, %v482_v56  ;;  %v523_v59 = vadd.f32 %v1741_v35, %v522_v57 }
 0x154   : > { %v2006_v60 = vpop.f32.mrf.mxu0  ;;  %v2018_v61 = vpop.f32.mrf.mxu1 }
 0x155   : > { %545 = vst [vmem:[%s2891_s21 + $0x20] sm:$0xff] %v483_v58  ;;  %553 = vst [vmem:[%s2891_s21 + $0x60] sm:$0xff] %v523_v59  ;;  %v498_v62 = vadd.f32 %v2006_v60, %v1741_v35  ;;  %v538_v63 = vadd.f32 %v2018_v61, %v1741_v35 }
 0x156   : > { %v492_v0 = vpop.f32.mrf.mxu0  ;;  %v532_v1 = vpop.f32.mrf.mxu1 }
 0x157   : > { %548 = vst [vmem:[%s2891_s21 + $0x38] sm:$0xff] %v498_v62  ;;  %556 = vst [vmem:[%s2891_s21 + $0x78] sm:$0xff] %v538_v63  ;;  %v493_v2 = vadd.f32 %v1741_v35, %v492_v0  ;;  %v533_v19 = vadd.f32 %v1741_v35, %v532_v1 }
 0x159   : > { %547 = vst [vmem:[%s2891_s21 + $0x30] sm:$0xff] %v493_v2  ;;  %555 = vst [vmem:[%s2891_s21 + $0x70] sm:$0xff] %v533_v19 }
 0x15a PF: > { %s557_s22 = sld [smem:[#allocation4 + %s2640_s11]] }
 0x160   : > { %p1742_p0 = scmp.eq.s32.totalorder %s557_s22, 0 }
 0x162   : > { %561 = sbr.rel (%p1742_p0) target bundleno = 658 (0x292), region = 82 }
 0x167   : > { %v593_v20 = vld [vmem:[%s2837_s8 + $0x78] sm:$0xff]  ;;  %v592_v22 = vld [vmem:[%s2837_s8 + $0x70] sm:$0xff]  ;;  %2051 = vmatprep.mubr.f32.mxu0 %v2857_v3  ;;  %2107 = vmatprep.mubr.f32.mxu1 %v2857_v3  ;;  %v591_v24 = vld [vmem:[%s2837_s8 + $0x68] sm:$0xff] }
 0x168   : > { %v1775_v21 = vld [vmem:[%s2837_s8 + $0xf8] sm:$0xff]  ;;  %2019 = vmatprep.subr.mxu0 %v593_v20  ;;  %v1774_v23 = vld [vmem:[%s2837_s8 + $0xf0] sm:$0xff]  ;;  %v1773_v25 = vld [vmem:[%s2837_s8 + $0xe8] sm:$0xff] }
 0x169   : > { %2075 = vmatprep.subr.mxu1 %v1775_v21  ;;  %2020 = vmatpush3.msra.mxu0 %v593_v20  ;;  %v590_v26 = vld [vmem:[%s2837_s8 + $0x60] sm:$0xff]  ;;  %v589_v28 = vld [vmem:[%s2837_s8 + $0x58] sm:$0xff]  ;;  %v588_v30 = vld [vmem:[%s2837_s8 + $0x50] sm:$0xff] }
 0x16a   : > { %2076 = vmatpush3.msra.mxu1 %v1775_v21  ;;  %2021 = vmatprep.subr.mxu0 %v592_v22  ;;  %v1772_v27 = vld [vmem:[%s2837_s8 + $0xe0] sm:$0xff]  ;;  %v1771_v29 = vld [vmem:[%s2837_s8 + $0xd8] sm:$0xff]  ;;  %v1770_v31 = vld [vmem:[%s2837_s8 + $0xd0] sm:$0xff] }
 0x16b   : > { %2077 = vmatprep.subr.mxu1 %v1774_v23  ;;  %2022 = vmatpush3.msra.mxu0 %v592_v22  ;;  %v587_v32 = vld [vmem:[%s2837_s8 + $0x48] sm:$0xff]  ;;  %v586_v34 = vld [vmem:[%s2837_s8 + $0x40] sm:$0xff]  ;;  %v585_v36 = vld [vmem:[%s2837_s8 + $0x38] sm:$0xff]  ;;  %v2664_v22 = vmov 0.0  }
 0x16c   : > { %2078 = vmatpush3.msra.mxu1 %v1774_v23  ;;  %2023 = vmatprep.subr.mxu0 %v591_v24  ;;  %v1769_v33 = vld [vmem:[%s2837_s8 + $0xc8] sm:$0xff]  ;;  %v1768_v35 = vld [vmem:[%s2837_s8 + $0xc0] sm:$0xff]  ;;  %v1767_v37 = vld [vmem:[%s2837_s8 + $0xb8] sm:$0xff] }
 0x16d   : > { %2079 = vmatprep.subr.mxu1 %v1773_v25  ;;  %2024 = vmatpush3.msra.mxu0 %v591_v24  ;;  %v584_v38 = vld [vmem:[%s2837_s8 + $0x30] sm:$0xff]  ;;  %v583_v40 = vld [vmem:[%s2837_s8 + $0x28] sm:$0xff]  ;;  %v582_v42 = vld [vmem:[%s2837_s8 + $0x20] sm:$0xff] }
 0x16e   : > { %2080 = vmatpush3.msra.mxu1 %v1773_v25  ;;  %2025 = vmatprep.subr.mxu0 %v590_v26  ;;  %v1766_v39 = vld [vmem:[%s2837_s8 + $0xb0] sm:$0xff]  ;;  %v1765_v41 = vld [vmem:[%s2837_s8 + $0xa8] sm:$0xff]  ;;  %v1764_v43 = vld [vmem:[%s2837_s8 + $0xa0] sm:$0xff] }
 0x16f   : > { %2081 = vmatprep.subr.mxu1 %v1772_v27  ;;  %2026 = vmatpush3.msra.mxu0 %v590_v26  ;;  %v581_v44 = vld [vmem:[%s2837_s8 + $0x18] sm:$0xff]  ;;  %v580_v46 = vld [vmem:[%s2837_s8 + $0x10] sm:$0xff]  ;;  %v579_v48 = vld [vmem:[%s2837_s8 + $0x8] sm:$0xff] }
 0x170   : > { %2082 = vmatpush3.msra.mxu1 %v1772_v27  ;;  %2027 = vmatprep.subr.mxu0 %v589_v28  ;;  %v1763_v45 = vld [vmem:[%s2837_s8 + $0x98] sm:$0xff]  ;;  %v1762_v47 = vld [vmem:[%s2837_s8 + $0x90] sm:$0xff]  ;;  %v1761_v49 = vld [vmem:[%s2837_s8 + $0x88] sm:$0xff] }
 0x171   : > { %2083 = vmatprep.subr.mxu1 %v1771_v29  ;;  %2028 = vmatpush3.msra.mxu0 %v589_v28  ;;  %v578_v50 = vld [vmem:[%s2837_s8] sm:$0xff]  ;;  %v1809_v52 = vld [vmem:[%s2837_s8 + $0x178] sm:$0xff]  ;;  %v1808_v53 = vld [vmem:[%s2837_s8 + $0x170] sm:$0xff] }
 0x172   : > { %2084 = vmatpush3.msra.mxu1 %v1771_v29  ;;  %2029 = vmatprep.subr.mxu0 %v588_v30  ;;  %v1760_v51 = vld [vmem:[%s2837_s8 + $0x80] sm:$0xff]  ;;  %v1807_v54 = vld [vmem:[%s2837_s8 + $0x168] sm:$0xff]  ;;  %v1805_v56 = vld [vmem:[%s2837_s8 + $0x158] sm:$0xff] }
 0x173   : > { %2085 = vmatprep.subr.mxu1 %v1770_v31  ;;  %2030 = vmatpush3.msra.mxu0 %v588_v30  ;;  %v1806_v55 = vld [vmem:[%s2837_s8 + $0x160] sm:$0xff]  ;;  %v1804_v57 = vld [vmem:[%s2837_s8 + $0x150] sm:$0xff]  ;;  %v1803_v58 = vld [vmem:[%s2837_s8 + $0x148] sm:$0xff] }
 0x174   : > { %2086 = vmatpush3.msra.mxu1 %v1770_v31  ;;  %2031 = vmatprep.subr.mxu0 %v587_v32  ;;  %v1802_v59 = vld [vmem:[%s2837_s8 + $0x140] sm:$0xff]  ;;  %v1801_v60 = vld [vmem:[%s2837_s8 + $0x138] sm:$0xff]  ;;  %v1800_v61 = vld [vmem:[%s2837_s8 + $0x130] sm:$0xff] }
 0x175   : > { %2087 = vmatprep.subr.mxu1 %v1769_v33  ;;  %2032 = vmatpush3.msra.mxu0 %v587_v32  ;;  %v1799_v62 = vld [vmem:[%s2837_s8 + $0x128] sm:$0xff]  ;;  %v1798_v63 = vld [vmem:[%s2837_s8 + $0x120] sm:$0xff]  ;;  %v1797_v20 = vld [vmem:[%s2837_s8 + $0x118] sm:$0xff]  ;;  %v2665_v32 = vmov 0  }
 0x176   : > { %2088 = vmatpush3.msra.mxu1 %v1769_v33  ;;  %2033 = vmatprep.subr.mxu0 %v586_v34  ;;  %v3020_v0 = vld [vmem:[%s2855_s19 + $0x20] sm:$0xff]  ;;  %v3023_v1 = vld [vmem:[%s2855_s19 + $0x28] sm:$0xff]  ;;  %v1796_v21 = vld [vmem:[%s2837_s8 + $0x110] sm:$0xff] }
 0x177   : > { %2089 = vmatprep.subr.mxu1 %v1768_v35  ;;  %2034 = vmatpush3.msra.mxu0 %v586_v34  ;;  %v3026_v2 = vld [vmem:[%s2855_s19] sm:$0xff]  ;;  %v3029_v19 = vld [vmem:[%s2855_s19 + $0x8] sm:$0xff]  ;;  %vm750_vm0 = vcmp.eq.s32.totalorder %v3020_v0, 0  ;;  %vm751_vm1 = vcmp.eq.s32.totalorder %v3023_v1, 0  ;;  %v3044_v25 = vld [vmem:[%s2855_s19 + $0x30] sm:$0xff] }
 0x178   : > { %2090 = vmatpush3.msra.mxu1 %v1768_v35  ;;  %2035 = vmatprep.subr.mxu0 %v585_v36  ;;  %vm746_vm2 = vcmp.eq.s32.totalorder %v3026_v2, 0  ;;  %vm747_vm3 = vcmp.eq.s32.totalorder %v3029_v19, 0  ;;  %v1748_v23 = vsel %vm750_vm0, 1.0, %v2664_v22  ;;  %v1749_v24 = vsel %vm751_vm1, 1.0, %v2664_v22  ;;  %v3049_v28 = vld [vmem:[%s2855_s19 + $0x38] sm:$0xff]  ;;  %v3052_v29 = vld [vmem:[%s2855_s19 + $0x10] sm:$0xff] }
 0x179   : > { %2091 = vmatprep.subr.mxu1 %v1767_v37  ;;  %2036 = vmatpush3.msra.mxu0 %v585_v36  ;;  %v1744_v26 = vsel %vm746_vm2, 1.0, %v2664_v22  ;;  %v1745_v27 = vsel %vm747_vm3, 1.0, %v2664_v22  ;;  %v3055_v30 = vld [vmem:[%s2855_s19 + $0x18] sm:$0xff]  ;;  %v2374_v31 = vpack.i.bf16 %v1749_v24, %v1748_v23  ;;  %vm752_vm4 = vcmp.eq.s32.totalorder %v3044_v25, 0  ;;  %v1795_v33 = vld [vmem:[%s2837_s8 + $0x108] sm:$0xff]  ;;  %v3064_v35 = vld [vmem:[%s2855_s19 + $0x50] sm:$0xff] }
 0x17a   : > { %2092 = vmatpush3.msra.mxu1 %v1767_v37  ;;  %2037 = vmatprep.subr.mxu0 %v584_v38  ;;  %v2363_v34 = vpack.i.bf16 %v1745_v27, %v1744_v26  ;;  %vm753_vm5 = vcmp.eq.s32.totalorder %v3049_v28, 0  ;;  %vm748_vm6 = vcmp.eq.s32.totalorder %v3052_v29, 0  ;;  %vm749_vm7 = vcmp.eq.s32.totalorder %v3055_v30, 0  ;;  %v3068_v36 = vld [vmem:[%s2855_s19 + $0x58] sm:$0xff]  ;;  %v3071_v37 = vld [vmem:[%s2855_s19 + $0x40] sm:$0xff] }
 0x17b   : > { %2093 = vmatprep.subr.mxu1 %v1766_v39  ;;  %2038 = vmatpush3.msra.mxu0 %v584_v38  ;;  %v3074_v38 = vld [vmem:[%s2855_s19 + $0x48] sm:$0xff]  ;;  %vm756_vm8 = vcmp.eq.s32.totalorder %v3064_v35, 0  ;;  %vm757_vm9 = vcmp.eq.s32.totalorder %v3068_v36, 0  ;;  %vm754_vm10 = vcmp.eq.s32.totalorder %v3071_v37, 0  ;;  %vm1078_vm0 = vcmp.eq.s32.totalorder %v3052_v29, 1 }
 0x17c   : > { %2094 = vmatpush3.msra.mxu1 %v1766_v39  ;;  %2039 = vmatprep.subr.mxu0 %v583_v40  ;;  %v1794_v39 = vld [vmem:[%s2837_s8 + $0x100] sm:$0xff]  ;;  %vm755_vm11 = vcmp.eq.s32.totalorder %v3074_v38, 0  ;;  %vm1079_vm1 = vcmp.eq.s32.totalorder %v3055_v30, 1  ;;  %vm1076_vm2 = vcmp.eq.s32.totalorder %v3026_v2, 1  ;;  %vm1077_vm3 = vcmp.eq.s32.totalorder %v3029_v19, 1 }
 0x17d   : > { %2095 = vmatprep.subr.mxu1 %v1765_v41  ;;  %2040 = vmatpush3.msra.mxu0 %v583_v40  ;;  %v1750_v40 = vsel %vm752_vm4, 1.0, %v2664_v22  ;;  %vm1082_vm4 = vcmp.eq.s32.totalorder %v3044_v25, 1 }
 0x17e   : > { %2096 = vmatpush3.msra.mxu1 %v1765_v41  ;;  %2041 = vmatprep.subr.mxu0 %v582_v42  ;;  %v1751_v41 = vsel %vm753_vm5, 1.0, %v2664_v22  ;;  %vm1083_vm5 = vcmp.eq.s32.totalorder %v3049_v28, 1 }
 0x17f   : > { %2097 = vmatprep.subr.mxu1 %v1764_v43  ;;  %2042 = vmatpush3.msra.mxu0 %v582_v42  ;;  %v1746_v42 = vsel %vm748_vm6, 1.0, %v2664_v22  ;;  %vm1080_vm6 = vcmp.eq.s32.totalorder %v3020_v0, 1 }
 0x180   : > { %2098 = vmatpush3.msra.mxu1 %v1764_v43  ;;  %2043 = vmatprep.subr.mxu0 %v581_v44  ;;  %v1747_v43 = vsel %vm749_vm7, 1.0, %v2664_v22  ;;  %vm1081_vm7 = vcmp.eq.s32.totalorder %v3023_v1, 1 }
 0x181   : > { %2099 = vmatprep.subr.mxu1 %v1763_v45  ;;  %2044 = vmatpush3.msra.mxu0 %v581_v44  ;;  %v3090_v44 = vld [vmem:[%s2855_s19 + $0x70] sm:$0xff] }
 0x182   : > { %2100 = vmatpush3.msra.mxu1 %v1763_v45  ;;  %2045 = vmatprep.subr.mxu0 %v580_v46  ;;  %v3093_v45 = vld [vmem:[%s2855_s19 + $0x78] sm:$0xff]  ;;  %vm760_vm12 = vcmp.eq.s32.totalorder %v3090_v44, 0 }
 0x183   : > { %2101 = vmatprep.subr.mxu1 %v1762_v47  ;;  %2046 = vmatpush3.msra.mxu0 %v580_v46  ;;  %v3096_v46 = vld [vmem:[%s2855_s19 + $0x60] sm:$0xff]  ;;  %vm761_vm13 = vcmp.eq.s32.totalorder %v3093_v45, 0 }
 0x184   : > { %2102 = vmatpush3.msra.mxu1 %v1762_v47  ;;  %2047 = vmatprep.subr.mxu0 %v579_v48  ;;  %v3099_v47 = vld [vmem:[%s2855_s19 + $0x68] sm:$0xff]  ;;  %vm758_vm14 = vcmp.eq.s32.totalorder %v3096_v46, 0 }
 0x185   : > { %2103 = vmatprep.subr.mxu1 %v1761_v49  ;;  %2048 = vmatpush3.msra.mxu0 %v579_v48  ;;  %v2379_v48 = vpack.i.bf16 %v1751_v41, %v1750_v40  ;;  %vm759_vm15 = vcmp.eq.s32.totalorder %v3099_v47, 0 }
 0x186   : > { %2104 = vmatpush3.msra.mxu1 %v1761_v49  ;;  %2049 = vmatprep.subr.mxu0 %v578_v50  ;;  %v2368_v49 = vpack.i.bf16 %v1747_v43, %v1746_v42 }
 0x187   : > { %2105 = vmatprep.subr.mxu1 %v1760_v51  ;;  %2050 = vmatpush3.msra.mxu0 %v578_v50  ;;  %v1754_v50 = vsel %vm756_vm8, 1.0, %v2664_v22  ;;  %vm1086_vm8 = vcmp.eq.s32.totalorder %v3064_v35, 1 }
 0x188   : > { %2106 = vmatpush3.msra.mxu1 %v1760_v51  ;;  %2052 = vmatmul.mubr.f32.vlgmr.msra.gmra.mxu0 %v2859_v4  ;;  %v1755_v51 = vsel %vm757_vm9, 1.0, %v2664_v22  ;;  %vm1087_vm9 = vcmp.eq.s32.totalorder %v3068_v36, 1 }
 0x189   : > { %2108 = vmatmul.mubr.f32.vlgmr.msra.gmra.mxu1 %v2859_v4  ;;  %2131 = vmatprep.subr.mxu0 %v1809_v52 }
 0x18a   : > { %2219 = vmatprep.subr.mxu1 %v1809_v52  ;;  %2132 = vmatpush3.msra.mxu0 %v1809_v52 }
 0x18b   : > { %2235 = vmatpush3.msra.mxu1 %v1809_v52  ;;  %2133 = vmatprep.subr.mxu0 %v1808_v53  ;;  %v1752_v52 = vsel %vm754_vm10, 1.0, %v2664_v22  ;;  %vm1084_vm10 = vcmp.eq.s32.totalorder %v3071_v37, 1 }
 0x18c   : > { %2220 = vmatprep.subr.mxu1 %v1808_v53  ;;  %2054 = vmatprep.mubr.f32.mxu0 %v2861_v5 }
 0x18d   : > { %2110 = vmatprep.mubr.f32.mxu1 %v2861_v5  ;;  %2134 = vmatpush3.msra.mxu0 %v1808_v53 }
 0x18e   : > { %2236 = vmatpush3.msra.mxu1 %v1808_v53  ;;  %2055 = vmatmul.mubr.f32.gmra.mxu0 %v2863_v6  ;;  %v1753_v53 = vsel %vm755_vm11, 1.0, %v2664_v22  ;;  %vm1085_vm11 = vcmp.eq.s32.totalorder %v3074_v38, 1 }
 0x18f   : > { %2111 = vmatmul.mubr.f32.gmra.mxu1 %v2863_v6  ;;  %2135 = vmatprep.subr.mxu0 %v1807_v54 }
 0x190   : > { %2221 = vmatprep.subr.mxu1 %v1807_v54  ;;  %2136 = vmatpush3.msra.mxu0 %v1807_v54 }
 0x191   : > { %2237 = vmatpush3.msra.mxu1 %v1807_v54  ;;  %2137 = vmatprep.subr.mxu0 %v1806_v55  ;;  %v2389_v54 = vpack.i.bf16 %v1755_v51, %v1754_v50 }
 0x192   : > { %2222 = vmatprep.subr.mxu1 %v1806_v55  ;;  %2057 = vmatprep.mubr.f32.mxu0 %v2865_v7 }
 0x193   : > { %2113 = vmatprep.mubr.f32.mxu1 %v2865_v7  ;;  %2138 = vmatpush3.msra.mxu0 %v1806_v55 }
 0x194   : > { %2238 = vmatpush3.msra.mxu1 %v1806_v55  ;;  %2058 = vmatmul.mubr.f32.gmra.mxu0 %v2867_v8  ;;  %v2384_v55 = vpack.i.bf16 %v1753_v53, %v1752_v52 }
 0x195   : > { %2114 = vmatmul.mubr.f32.gmra.mxu1 %v2867_v8  ;;  %2139 = vmatprep.subr.mxu0 %v1805_v56 }
 0x196   : > { %2223 = vmatprep.subr.mxu1 %v1805_v56  ;;  %2140 = vmatpush3.msra.mxu0 %v1805_v56 }
 0x197   : > { %2239 = vmatpush3.msra.mxu1 %v1805_v56  ;;  %2141 = vmatprep.subr.mxu0 %v1804_v57  ;;  %v1756_v56 = vsel %vm758_vm14, 1.0, %v2664_v22  ;;  %vm1088_vm14 = vcmp.eq.s32.totalorder %v3096_v46, 1 }
 0x198   : > { %2224 = vmatprep.subr.mxu1 %v1804_v57  ;;  %2060 = vmatprep.mubr.f32.mxu0 %v2869_v9  ;;  %v1790_v23 = vsel %vm1088_vm14, 1.0, %v2664_v22  ;;  %vm1418_vm14 = vcmp.eq.s32.totalorder %v3096_v46, 2 }
 0x199   : > { %2116 = vmatprep.mubr.f32.mxu1 %v2869_v9  ;;  %2142 = vmatpush3.msra.mxu0 %v1804_v57  ;;  %v1824_v43 = vsel %vm1418_vm14, 1.0, %v2664_v22 }
 0x19a   : > { %2240 = vmatpush3.msra.mxu1 %v1804_v57  ;;  %2061 = vmatmul.mubr.f32.gmra.mxu0 %v2871_v10  ;;  %v1757_v57 = vsel %vm759_vm15, 1.0, %v2664_v22  ;;  %vm1089_vm15 = vcmp.eq.s32.totalorder %v3099_v47, 1 }
 0x19b   : > { %2117 = vmatmul.mubr.f32.gmra.mxu1 %v2871_v10  ;;  %2143 = vmatprep.subr.mxu0 %v1803_v58  ;;  %v1791_v24 = vsel %vm1089_vm15, 1.0, %v2664_v22  ;;  %vm1419_vm15 = vcmp.eq.s32.totalorder %v3099_v47, 2 }
 0x19c   : > { %2225 = vmatprep.subr.mxu1 %v1803_v58  ;;  %2144 = vmatpush3.msra.mxu0 %v1803_v58  ;;  %v2434_v27 = vpack.i.bf16 %v1791_v24, %v1790_v23 }
 0x19d   : > { %2241 = vmatpush3.msra.mxu1 %v1803_v58  ;;  %2145 = vmatprep.subr.mxu0 %v1802_v59  ;;  %v1778_v58 = vsel %vm1076_vm2, 1.0, %v2664_v22  ;;  %vm1406_vm2 = vcmp.eq.s32.totalorder %v3026_v2, 2 }
 0x19e   : > { %2226 = vmatprep.subr.mxu1 %v1802_v59  ;;  %2063 = vmatprep.mubr.f32.mxu0 %v2873_v11 }
 0x19f   : > { %2119 = vmatprep.mubr.f32.mxu1 %v2873_v11  ;;  %2146 = vmatpush3.msra.mxu0 %v1802_v59 }
 0x1a0   : > { %2242 = vmatpush3.msra.mxu1 %v1802_v59  ;;  %2064 = vmatmul.mubr.f32.gmra.mxu0 %v2875_v12  ;;  %v1779_v59 = vsel %vm1077_vm3, 1.0, %v2664_v22  ;;  %vm1407_vm3 = vcmp.eq.s32.totalorder %v3029_v19, 2 }
 0x1a1   : > { %2120 = vmatmul.mubr.f32.gmra.mxu1 %v2875_v12  ;;  %2147 = vmatprep.subr.mxu0 %v1801_v60 }
 0x1a2   : > { %2227 = vmatprep.subr.mxu1 %v1801_v60  ;;  %2148 = vmatpush3.msra.mxu0 %v1801_v60 }
 0x1a3   : > { %2243 = vmatpush3.msra.mxu1 %v1801_v60  ;;  %2149 = vmatprep.subr.mxu0 %v1800_v61  ;;  %v1782_v60 = vsel %vm1080_vm6, 1.0, %v2664_v22  ;;  %vm1410_vm6 = vcmp.eq.s32.totalorder %v3020_v0, 2 }
 0x1a4   : > { %2228 = vmatprep.subr.mxu1 %v1800_v61  ;;  %2066 = vmatprep.mubr.f32.mxu0 %v2877_v13 }
 0x1a5   : > { %2122 = vmatprep.mubr.f32.mxu1 %v2877_v13  ;;  %2150 = vmatpush3.msra.mxu0 %v1800_v61 }
 0x1a6   : > { %2244 = vmatpush3.msra.mxu1 %v1800_v61  ;;  %2067 = vmatmul.mubr.f32.gmra.mxu0 %v2879_v14  ;;  %v1783_v61 = vsel %vm1081_vm7, 1.0, %v2664_v22  ;;  %vm1411_vm7 = vcmp.eq.s32.totalorder %v3023_v1, 2 }
 0x1a7   : > { %2123 = vmatmul.mubr.f32.gmra.mxu1 %v2879_v14  ;;  %2151 = vmatprep.subr.mxu0 %v1799_v62  ;;  %v1817_v40 = vsel %vm1411_vm7, 1.0, %v2664_v22 }
 0x1a8   : > { %2229 = vmatprep.subr.mxu1 %v1799_v62  ;;  %2152 = vmatpush3.msra.mxu0 %v1799_v62 }
 0x1a9   : > { %2245 = vmatpush3.msra.mxu1 %v1799_v62  ;;  %2153 = vmatprep.subr.mxu0 %v1798_v63  ;;  %v1786_v62 = vsel %vm1084_vm10, 1.0, %v2664_v22  ;;  %vm1414_vm10 = vcmp.eq.s32.totalorder %v3071_v37, 2 }
 0x1aa   : > { %2230 = vmatprep.subr.mxu1 %v1798_v63  ;;  %2069 = vmatprep.mubr.f32.mxu0 %v2881_v15  ;;  %v1820_v41 = vsel %vm1414_vm10, 1.0, %v2664_v22 }
 0x1ab   : > { %2125 = vmatprep.mubr.f32.mxu1 %v2881_v15  ;;  %2154 = vmatpush3.msra.mxu0 %v1798_v63 }
 0x1ac   : > { %2246 = vmatpush3.msra.mxu1 %v1798_v63  ;;  %2070 = vmatmul.mubr.f32.gmra.mxu0 %v2883_v16  ;;  %v1787_v63 = vsel %vm1085_vm11, 1.0, %v2664_v22  ;;  %vm1415_vm11 = vcmp.eq.s32.totalorder %v3074_v38, 2 }
 0x1ad   : > { %2126 = vmatmul.mubr.f32.gmra.mxu1 %v2883_v16  ;;  %2155 = vmatprep.subr.mxu0 %v1797_v20  ;;  %v1821_v42 = vsel %vm1415_vm11, 1.0, %v2664_v22 }
 0x1ae   : > { %2231 = vmatprep.subr.mxu1 %v1797_v20  ;;  %2156 = vmatpush3.msra.mxu0 %v1797_v20 }
 0x1af   : > { %2247 = vmatpush3.msra.mxu1 %v1797_v20  ;;  %2157 = vmatprep.subr.mxu0 %v1796_v21 }
 0x1b0   : > { %2232 = vmatprep.subr.mxu1 %v1796_v21  ;;  %2128 = vmatprep.mubr.f32.mxu1 %v2885_v17 }
 0x1b1   : > { %2248 = vmatpush3.msra.mxu1 %v1796_v21  ;;  %2373 = vset.pattern.permute.xlu1 %v2665_v32 }
 0x1b2   : > { %2362 = vset.pattern.permute.xlu0 %v2665_v32  ;;  %2072 = vmatprep.mubr.f32.mxu0 %v2885_v17 }
 0x1b3   : > { %2158 = vmatpush3.msra.mxu0 %v1796_v21  ;;  %2129 = vmatmul.mubr.f32.gmra.mxu1 %v2887_v18 }
 0x1b4   : > { %2073 = vmatmul.mubr.f32.gmra.mxu0 %v2887_v18  ;;  %2159 = vmatprep.subr.mxu0 %v1795_v33 }
 0x1b5   : > { %2233 = vmatprep.subr.mxu1 %v1795_v33  ;;  %2375 = vperm.xlu1 %2373, %v2374_v31  }
 0x1b6   : > { %2364 = vperm.xlu0 %2362, %v2363_v34   ;;  %2160 = vmatpush3.msra.mxu0 %v1795_v33  ;;  %v1813_v34 = vsel %vm1407_vm3, 1.0, %v2664_v22 }
 0x1b7   : > { %2249 = vmatpush3.msra.mxu1 %v1795_v33  ;;  %2161 = vmatprep.subr.mxu0 %v1794_v39  ;;  %v1812_v33 = vsel %vm1406_vm2, 1.0, %v2664_v22 }
 0x1b8   : > { %2234 = vmatprep.subr.mxu1 %v1794_v39  ;;  %2162 = vmatpush3.msra.mxu0 %v1794_v39  ;;  %v2444_v19 = vpack.i.bf16 %v1813_v34, %v1812_v33 }
 0x1b9   : > { %2250 = vmatpush3.msra.mxu1 %v1794_v39  ;;  %2163 = vmatprep.mubr.f32.mxu0 %v2857_v3  ;;  %v1758_v3 = vsel %vm760_vm12, 1.0, %v2664_v22  ;;  %vm1090_vm12 = vcmp.eq.s32.totalorder %v3090_v44, 1  ;;  %v1816_v39 = vsel %vm1410_vm6, 1.0, %v2664_v22 }
 0x1ba   : > { %2175 = vmatprep.mubr.f32.mxu1 %v2873_v11  ;;  %2164 = vmatmul.mubr.f32.vlgmr.msra.gmra.mxu0 %v2859_v4  ;;  %v1759_v11 = vsel %vm761_vm13, 1.0, %v2664_v22  ;;  %vm1091_vm13 = vcmp.eq.s32.totalorder %v3093_v45, 1  ;;  %v1792_v20 = vsel %vm1090_vm12, 1.0, %v2664_v22  ;;  %v2454_v1 = vpack.i.bf16 %v1817_v40, %v1816_v39 }
 0x1bb   : > { %2176 = vmatmul.mubr.f32.vlgmr.msra.gmra.mxu1 %v2875_v12  ;;  %2380 = vperm.xlu1 %2373, %v2379_v48   ;;  %v2399_v4 = vpack.i.bf16 %v1759_v11, %v1758_v3  ;;  %v1780_v12 = vsel %vm1078_vm0, 1.0, %v2664_v22  ;;  %v1793_v21 = vsel %vm1091_vm13, 1.0, %v2664_v22  ;;  %vm1408_vm0 = vcmp.eq.s32.totalorder %v3052_v29, 2 }
 0x1bc   : > { %2369 = vperm.xlu0 %2362, %v2368_v49   ;;  %2166 = vmatprep.mubr.f32.mxu0 %v2861_v5  ;;  %v2394_v5 = vpack.i.bf16 %v1757_v57, %v1756_v56  ;;  %v2439_v26 = vpack.i.bf16 %v1793_v21, %v1792_v20  ;;  %v1814_v31 = vsel %vm1408_vm0, 1.0, %v2664_v22  ;;  %vm1420_vm12 = vcmp.eq.s32.totalorder %v3090_v44, 2  ;;  %v3252_v20 = vld [vmem:[%s2889_s18] ss:$0 sm:$0xff]  ;;  %v3255_v21 = vld [vmem:[%s2889_s18 + $0x1] ss:$0 sm:$0xff] }
 0x1bd   : > { %2178 = vmatprep.mubr.f32.mxu1 %v2877_v13  ;;  %v1781_v13 = vsel %vm1079_vm1, 1.0, %v2664_v22  ;;  %vm1409_vm1 = vcmp.eq.s32.totalorder %v3055_v30, 2  ;;  %vm1421_vm13 = vcmp.eq.s32.totalorder %v3093_v45, 2  ;;  %v1826_v37 = vsel %vm1420_vm12, 1.0, %v2664_v22 }
 0x1be   : > { %2167 = vmatmul.mubr.f32.gmra.mxu0 %v2863_v6  ;;  %v2409_v6 = vpack.i.bf16 %v1781_v13, %v1780_v12  ;;  %v1815_v32 = vsel %vm1409_vm1, 1.0, %v2664_v22  ;;  %v1827_v38 = vsel %vm1421_vm13, 1.0, %v2664_v22  ;;  %v1825_v48 = vsel %vm1419_vm15, 1.0, %v2664_v22 }
 0x1bf   : > { %2179 = vmatmul.mubr.f32.gmra.mxu1 %v2879_v14  ;;  %2390 = vperm.xlu1 %2373, %v2389_v54   ;;  %v1784_v14 = vsel %vm1082_vm4, 1.0, %v2664_v22  ;;  %vm1412_vm4 = vcmp.eq.s32.totalorder %v3044_v25, 2  ;;  %v2449_v2 = vpack.i.bf16 %v1815_v32, %v1814_v31  ;;  %v2479_v44 = vpack.i.bf16 %v1827_v38, %v1826_v37 }
 0x1c0   : > { %2385 = vperm.xlu0 %2362, %v2384_v55   ;;  %2169 = vmatprep.mubr.f32.mxu0 %v2865_v7  ;;  %v2404_v7 = vpack.i.bf16 %v1779_v59, %v1778_v58  ;;  %v1818_v29 = vsel %vm1412_vm4, 1.0, %v2664_v22  ;;  %v2474_v45 = vpack.i.bf16 %v1825_v48, %v1824_v43 }
 0x1c1   : > { %2181 = vmatprep.mubr.f32.mxu1 %v2881_v15  ;;  %v1785_v15 = vsel %vm1083_vm5, 1.0, %v2664_v22  ;;  %vm1413_vm5 = vcmp.eq.s32.totalorder %v3049_v28, 2 }
 0x1c2   : > { %2170 = vmatmul.mubr.f32.gmra.mxu0 %v2867_v8  ;;  %v2419_v8 = vpack.i.bf16 %v1785_v15, %v1784_v14  ;;  %v1819_v30 = vsel %vm1413_vm5, 1.0, %v2664_v22 }
 0x1c3   : > { %2182 = vmatmul.mubr.f32.gmra.mxu1 %v2883_v16  ;;  %2400 = vperm.xlu1 %2373, %v2399_v4   ;;  %v1788_v16 = vsel %vm1086_vm8, 1.0, %v2664_v22  ;;  %vm1416_vm8 = vcmp.eq.s32.totalorder %v3064_v35, 2  ;;  %v2459_v0 = vpack.i.bf16 %v1819_v30, %v1818_v29 }
 0x1c4   : > { %2395 = vperm.xlu0 %2362, %v2394_v5   ;;  %2172 = vmatprep.mubr.f32.mxu0 %v2869_v9  ;;  %v2414_v9 = vpack.i.bf16 %v1783_v61, %v1782_v60  ;;  %v1822_v25 = vsel %vm1416_vm8, 1.0, %v2664_v22 }
 0x1c5   : > { %2184 = vmatprep.mubr.f32.mxu1 %v2885_v17  ;;  %v1789_v17 = vsel %vm1087_vm9, 1.0, %v2664_v22  ;;  %vm1417_vm9 = vcmp.eq.s32.totalorder %v3068_v36, 2  ;;  %v2464_v36 = vpack.i.bf16 %v1821_v42, %v1820_v41 }
 0x1c6   : > { %2173 = vmatmul.mubr.f32.gmra.mxu0 %v2871_v10  ;;  %v2429_v10 = vpack.i.bf16 %v1789_v17, %v1788_v16  ;;  %v1823_v28 = vsel %vm1417_vm9, 1.0, %v2664_v22 }
 0x1c7   : > { %2185 = vmatmul.mubr.f32.gmra.mxu1 %v2887_v18  ;;  %2410 = vperm.xlu1 %2373, %v2409_v6   ;;  %v2424_v18 = vpack.i.bf16 %v1787_v63, %v1786_v62  ;;  %v2469_v35 = vpack.i.bf16 %v1823_v28, %v1822_v25 }
 0x1c8   : > { %2405 = vperm.xlu0 %2362, %v2404_v7  }
 0x1cb   : > { %2420 = vperm.xlu1 %2373, %v2419_v8  }
 0x1cc   : > { %2415 = vperm.xlu0 %2362, %v2414_v9  }
 0x1cf   : > { %2430 = vperm.xlu1 %2373, %v2429_v10  }
 0x1d0   : > { %2425 = vperm.xlu0 %2362, %v2424_v18  }
 0x1d3   : > { %2440 = vperm.xlu1 %2373, %v2439_v26  }
 0x1d4   : > { %2435 = vperm.xlu0 %2362, %v2434_v27  }
 0x1d7   : > { %2450 = vperm.xlu1 %2373, %v2449_v2  }
 0x1d8   : > { %2445 = vperm.xlu0 %2362, %v2444_v19  }
 0x1db   : > { %2460 = vperm.xlu1 %2373, %v2459_v0  }
 0x1dc   : > { %2455 = vperm.xlu0 %2362, %v2454_v1  }
 0x1df   : > { %2470 = vperm.xlu1 %2373, %v2469_v35  }
 0x1e0   : > { %2465 = vperm.xlu0 %2362, %v2464_v36  }
 0x1e3   : > { %2480 = vperm.xlu1 %2373, %v2479_v44  }
 0x1e4   : > { %2475 = vperm.xlu0 %2362, %v2474_v45  }
 0x230   : > { %v3201_v46 = vpop.permute.xlu1 %2375 }
 0x231   : > { %v3203_v47 = vpop.permute.xlu0 %2364  ;;  %v2378_v10 = vunpack.i.h.bf16 %v3201_v46  ;;  %v2377_v18 = vunpack.i.l.bf16 %v3201_v46 }
 0x232   : > { %v2367_v26 = vunpack.i.h.bf16 %v3203_v47  ;;  %v2366_v27 = vunpack.i.l.bf16 %v3203_v47 }
 0x236   : > { %v3205_v49 = vpop.permute.xlu1 %2380 }
 0x237   : > { %v3207_v50 = vpop.permute.xlu0 %2369 }
 0x238   : > { %v2372_v2 = vunpack.i.h.bf16 %v3207_v50  ;;  %v2371_v19 = vunpack.i.l.bf16 %v3207_v50 }
 0x23a   : > { %v3209_v51 = vpop.permute.xlu1 %2390 }
 0x23b   : > { %v3211_v52 = vpop.permute.xlu0 %2385 }
 0x23e   : > { %v3213_v53 = vpop.permute.xlu1 %2400 }
 0x23f   : > { %v3215_v22 = vpop.permute.xlu0 %2395 }
 0x242   : > { %v3217_v54 = vpop.permute.xlu1 %2410 }
 0x243   : > { %v3219_v55 = vpop.permute.xlu0 %2405  ;;  %v2413_v44 = vunpack.i.h.bf16 %v3217_v54  ;;  %v2412_v45 = vunpack.i.l.bf16 %v3217_v54 }
 0x244   : > { %v2408_v1 = vunpack.i.h.bf16 %v3219_v55  ;;  %v2407_v38 = vunpack.i.l.bf16 %v3219_v55 }
 0x246   : > { %v3221_v4 = vpop.permute.xlu1 %2420 }
 0x247   : > { %v3223_v5 = vpop.permute.xlu0 %2415 }
 0x248   : > { %v2053_v3 = vpop.f32.mrf.mxu0  ;;  %v2418_v35 = vunpack.i.h.bf16 %v3223_v5  ;;  %v2417_v55 = vunpack.i.l.bf16 %v3223_v5 }
 0x249   : > { %v2109_v11 = vpop.f32.mrf.mxu1  ;;  %v673_v25 = vadd.f32 %v2053_v3, %v3252_v20 }
 0x24a   : > { %v667_v56 = vpop.f32.mrf.mxu0  ;;  %v3225_v6 = vpop.permute.xlu1 %2430  ;;  %v1003_v28 = vadd.f32 %v2109_v11, %v3255_v21 }
 0x24b   : > { %v997_v57 = vpop.f32.mrf.mxu1  ;;  %v3227_v7 = vpop.permute.xlu0 %2425  ;;  %v668_v43 = vadd.f32 %v3252_v20, %v667_v56 }
 0x24c   : > { %v998_v48 = vadd.f32 %v3255_v21, %v997_v57  ;;  %v875_v57 = vmul.f32 %v2367_v26, %v673_v25  ;;  %v1205_v37 = vmul.f32 %v2408_v1, %v1003_v28  ;;  %v2428_v31 = vunpack.i.h.bf16 %v3227_v7 }
 0x24d   : > { %v874_v0 = vmul.f32 %v2366_v27, %v668_v43  ;;  %v2427_v26 = vunpack.i.l.bf16 %v3227_v7  ;;  %v3613_v7 = vunpack.i.h.bf16 %v3215_v22 }
 0x24e   : > { %v2056_v12 = vpop.f32.mrf.mxu0  ;;  %v3237_v8 = vpop.permute.xlu1 %2440  ;;  %v1204_v47 = vmul.f32 %v2407_v38, %v998_v48 }
 0x24f   : > { %v2112_v13 = vpop.f32.mrf.mxu1  ;;  %v3239_v9 = vpop.permute.xlu0 %2435  ;;  %v683_v54 = vadd.f32 %v2056_v12, %v3252_v20 }
 0x250   : > { %v677_v58 = vpop.f32.mrf.mxu0  ;;  %v1013_v32 = vadd.f32 %v2112_v13, %v3255_v21 }
 0x251   : > { %v1007_v59 = vpop.f32.mrf.mxu1  ;;  %v678_v50 = vadd.f32 %v3252_v20, %v677_v58  ;;  %v877_v25 = vmul.f32 %v2372_v2, %v683_v54  ;;  %v2437_v58 = vunpack.i.l.bf16 %v3239_v9 }
 0x252   : > { %v3265_v33 = vpop.permute.xlu1 %2450  ;;  %v1008_v36 = vadd.f32 %v3255_v21, %v1007_v59  ;;  %v3316_v59 = vadd.f32 %v1205_v37, %v875_v57  ;;  %v1207_v28 = vmul.f32 %v2413_v44, %v1013_v32  ;;  %v3325_v37 = vadd.f32 %v1204_v47, %v874_v0 }
 0x253   : > { %v3267_v34 = vpop.permute.xlu0 %2445  ;;  %v876_v38 = vmul.f32 %v2371_v19, %v678_v50  ;;  %v3606_v50 = vunpack.i.h.bf16 %v3221_v4 }
 0x254   : > { %v3229_v14 = vpop.f32.mrf.mxu0  ;;  %v1206_v43 = vmul.f32 %v2412_v45, %v1008_v36  ;;  %v2448_v19 = vunpack.i.h.bf16 %v3267_v34  ;;  %v3402_v36 = vld [vmem:[%s2889_s18 + $0x2] ss:$0 sm:$0xff] }
 0x255   : > { %v3231_v15 = vpop.f32.mrf.mxu1  ;;  %v693_v12 = vadd.f32 %v3229_v14, %v3252_v20  ;;  %v3341_v14 = vadd.f32 %v1207_v28, %v877_v25 }
 0x256   : > { %v3233_v60 = vpop.f32.mrf.mxu0  ;;  %v3299_v42 = vpop.permute.xlu1 %2460  ;;  %v1023_v13 = vadd.f32 %v3231_v15, %v3255_v21  ;;  %v2438_v15 = vunpack.i.h.bf16 %v3239_v9 }
 0x257   : > { %v3235_v61 = vpop.f32.mrf.mxu1  ;;  %v3301_v56 = vpop.permute.xlu0 %2455  ;;  %v688_v1 = vadd.f32 %v3252_v20, %v3233_v60  ;;  %v879_v32 = vmul.f32 %v2378_v10, %v693_v12  ;;  %v3343_v60 = vadd.f32 %v1206_v43, %v876_v38 }
 0x258   : > { %v1018_v27 = vadd.f32 %v3255_v21, %v3235_v61  ;;  %v1209_v2 = vmul.f32 %v2418_v35, %v1023_v13 }
 0x259   : > { %v878_v0 = vmul.f32 %v2377_v18, %v688_v1 }
 0x25a   : > { %v3241_v16 = vpop.f32.mrf.mxu0  ;;  %v3329_v41 = vpop.permute.xlu1 %2470  ;;  %v1208_v44 = vmul.f32 %v2417_v55, %v1018_v27  ;;  %v3354_v1 = vadd.f32 %v1209_v2, %v879_v32  ;;  %v3610_v27 = vunpack.i.h.bf16 %v3225_v6 }
 0x25b   : > { %v3243_v17 = vpop.f32.mrf.mxu1  ;;  %v3331_v61 = vpop.permute.xlu0 %2465  ;;  %v703_v12 = vadd.f32 %v3241_v16, %v3252_v20 }
 0x25c   : > { %v3245_v62 = vpop.f32.mrf.mxu0  ;;  %v1033_v46 = vadd.f32 %v3243_v17, %v3255_v21  ;;  %v2468_v13 = vunpack.i.h.bf16 %v3331_v61  ;;  %v3357_v25 = vadd.f32 %v1208_v44, %v878_v0 }
 0x25d   : > { %v3247_v63 = vpop.f32.mrf.mxu1 }
 0x25e   : > { %v3363_v43 = vpop.permute.xlu1 %2480  ;;  %v1211_v35 = vmul.f32 %v3606_v50, %v1033_v46 }
 0x260   : > { %v3257_v23 = vpop.f32.mrf.mxu0 }
 0x261   : > { %v3259_v24 = vpop.f32.mrf.mxu1  ;;  %v713_v28 = vadd.f32 %v3257_v23, %v3252_v20  ;;  %v3373_v23 = vpop.permute.xlu0 %2475 }
 0x262   : > { %v3273_v39 = vpop.f32.mrf.mxu0  ;;  %v1043_v16 = vadd.f32 %v3259_v24, %v3255_v21  ;;  %v3605_v24 = vunpack.i.h.bf16 %v3205_v49  ;;  %v2478_v50 = vunpack.i.h.bf16 %v3373_v23 }
 0x263   : > { %v3275_v40 = vpop.f32.mrf.mxu1  ;;  %v708_v54 = vadd.f32 %v3252_v20, %v3273_v39 }
 0x264   : > { %v1038_v32 = vadd.f32 %v3255_v21, %v3275_v40  ;;  %v881_v44 = vmul.f32 %v3605_v24, %v703_v12  ;;  %v698_v40 = vadd.f32 %v3252_v20, %v3245_v62  ;;  %v3608_v62 = vunpack.i.l.bf16 %v3211_v52 }
 0x266   : > { %v3293_v3 = vpop.f32.mrf.mxu0  ;;  %v882_v57 = vmul.f32 %v3608_v62, %v708_v54  ;;  %v3416_v62 = vadd.f32 %v1211_v35, %v881_v44 }
 0x267   : > { %v3295_v11 = vpop.f32.mrf.mxu1  ;;  %v723_v2 = vadd.f32 %v3293_v3, %v3252_v20  ;;  %v1028_v3 = vadd.f32 %v3255_v21, %v3247_v63  ;;  %v1212_v63 = vmul.f32 %v2427_v26, %v1038_v32 }
 0x268   : > { %v717_v30 = vpop.f32.mrf.mxu0  ;;  %v1053_v0 = vadd.f32 %v3295_v11, %v3255_v21 }
 0x269   : > { %v1047_v29 = vpop.f32.mrf.mxu1  ;;  %v718_v10 = vadd.f32 %v3252_v20, %v717_v30  ;;  %v3607_v30 = vunpack.i.h.bf16 %v3211_v52  ;;  %v3612_v52 = vunpack.i.l.bf16 %v3225_v6 }
 0x26a   : > { %v1048_v39 = vadd.f32 %v3255_v21, %v1047_v29  ;;  %v1213_v29 = vmul.f32 %v2428_v31, %v1043_v16  ;;  %v1215_v24 = vmul.f32 %v3610_v27, %v1053_v0  ;;  %v3611_v31 = vunpack.i.l.bf16 %v3209_v51 }
 0x26b   : > { %v883_v46 = vmul.f32 %v3607_v30, %v713_v28  ;;  %v2477_v28 = vunpack.i.l.bf16 %v3373_v23 }
 0x26c   : > { %v2071_v48 = vpop.f32.mrf.mxu0  ;;  %v884_v16 = vmul.f32 %v3611_v31, %v718_v10  ;;  %v1214_v54 = vmul.f32 %v3612_v52, %v1048_v39 }
 0x26d   : > { %v2127_v5 = vpop.f32.mrf.mxu1  ;;  %v733_v11 = vadd.f32 %v2071_v48, %v3252_v20 }
 0x26e   : > { %v727_v45 = vpop.f32.mrf.mxu0  ;;  %v1063_v55 = vadd.f32 %v2127_v5, %v3255_v21  ;;  %v3609_v5 = vunpack.i.h.bf16 %v3209_v51  ;;  %v3614_v51 = vunpack.i.l.bf16 %v3205_v49  ;;  %v1230_v52 = vadd.f32 %v1214_v54, %v884_v16 }
 0x26f   : > { %v1057_v47 = vpop.f32.mrf.mxu1  ;;  %v887_v26 = vmul.f32 %v3613_v7, %v733_v11  ;;  %v728_v27 = vadd.f32 %v3252_v20, %v727_v45  ;;  %v3615_v11 = vunpack.i.l.bf16 %v3221_v4  ;;  %v1228_v45 = vadd.f32 %v1212_v63, %v882_v57 }
 0x270   : > { %v885_v48 = vmul.f32 %v3609_v5, %v723_v2  ;;  %v1217_v32 = vmul.f32 %v2438_v15, %v1063_v55  ;;  %v1058_v2 = vadd.f32 %v3255_v21, %v1057_v47  ;;  %v3420_v10 = vmul.f32 %v3614_v51, %v698_v40 }
 0x271   : > { %v3426_v5 = vmul.f32 %v3615_v11, %v1028_v3  ;;  %v1229_v15 = vadd.f32 %v1213_v29, %v883_v46  ;;  %v3616_v4 = vunpack.i.l.bf16 %v3215_v22 }
 0x272   : > { %v1231_v55 = vadd.f32 %v1215_v24, %v885_v48  ;;  %v1233_v7 = vadd.f32 %v1217_v32, %v887_v26  ;;  %v1216_v57 = vmul.f32 %v2437_v58, %v1058_v2  ;;  %v3618_v48 = vunpack.i.l.bf16 %v3331_v61 }
 0x273   : > { %v2130_v17 = vpop.f32.mrf.mxu1  ;;  %v886_v3 = vmul.f32 %v3616_v4, %v728_v27  ;;  %v3619_v2 = vunpack.i.h.bf16 %v3265_v33  ;;  %v3625_v4 = vunpack.i.h.bf16 %v3301_v56 }
 0x274   : > { %v2074_v38 = vpop.f32.mrf.mxu0  ;;  %v1073_v22 = vadd.f32 %v2130_v17, %v3255_v21 }
 0x275   : > { %v1067_v12 = vpop.f32.mrf.mxu1  ;;  %v743_v54 = vadd.f32 %v2074_v38, %v3252_v20 }
 0x276   : > { %v737_v18 = vpop.f32.mrf.mxu0  ;;  %v1068_v17 = vadd.f32 %v3255_v21, %v1067_v12 }
 0x277   : > { %v738_v38 = vadd.f32 %v3252_v20, %v737_v18  ;;  %v3623_v18 = vunpack.i.h.bf16 %v3213_v53 }
 0x279   : > { %v889_v12 = vmul.f32 %v3623_v18, %v743_v54 }
 0x27a   : > { %v2165_v0 = vpop.f32.mrf.mxu0 }
 0x27b   : > { %v2177_v30 = vpop.f32.mrf.mxu1  ;;  %v1333_v6 = vadd.f32 %v2165_v0, %v3402_v36 }
 0x27c   : > { %v1373_v39 = vadd.f32 %v2177_v30, %v3402_v36  ;;  %v1327_v47 = vpop.f32.mrf.mxu0  ;;  %v3620_v30 = vunpack.i.h.bf16 %v3329_v41 }
 0x27d   : > { %v1367_v31 = vpop.f32.mrf.mxu1  ;;  %v1535_v35 = vmul.f32 %v2448_v19, %v1333_v6  ;;  %v1328_v49 = vadd.f32 %v3402_v36, %v1327_v47  ;;  %v3624_v47 = vunpack.i.h.bf16 %v3237_v8 }
 0x27e   : > { %v1543_v44 = vmul.f32 %v2468_v13, %v1373_v39  ;;  %v1368_v40 = vadd.f32 %v3402_v36, %v1367_v31  ;;  %v2168_v24 = vpop.f32.mrf.mxu0  ;;  %v3617_v13 = vunpack.i.l.bf16 %v3267_v34 }
 0x27f   : > { %v2180_v46 = vpop.f32.mrf.mxu1  ;;  %v1551_v29 = vadd.f32 %v1535_v35, %v3316_v59  ;;  %v1343_v26 = vadd.f32 %v2168_v24, %v3402_v36  ;;  %v1219_v31 = vmul.f32 %v3624_v47, %v1073_v22  ;;  %v3628_v22 = vunpack.i.l.bf16 %v3301_v56 }
 0x280   : > { %v1559_v19 = vadd.f32 %v1543_v44, %v1229_v15  ;;  %v1534_v63 = vmul.f32 %v3617_v13, %v1328_v49  ;;  %v1542_v16 = vmul.f32 %v3618_v48, %v1368_v40  ;;  %v1383_v9 = vadd.f32 %v2180_v46, %v3402_v36  ;;  %v1337_v58 = vpop.f32.mrf.mxu0 }
 0x281   : > { %v1377_v32 = vpop.f32.mrf.mxu1  ;;  %1567 = vst [vmem:[%s2891_s21 + $0x8] sm:$0xff] %v1551_v29  ;;  %v1338_v61 = vadd.f32 %v3402_v36, %v1337_v58  ;;  %v1537_v0 = vmul.f32 %v3619_v2, %v1343_v26  ;;  %v3622_v15 = vunpack.i.l.bf16 %v3329_v41  ;;  %v3626_v29 = vunpack.i.l.bf16 %v3213_v53 }
 0x282   : > { %1575 = vst [vmem:[%s2891_s21 + $0x48] sm:$0xff] %v1559_v19  ;;  %v1550_v34 = vadd.f32 %v1534_v63, %v3325_v37  ;;  %v1558_v59 = vadd.f32 %v1542_v16, %v1228_v45  ;;  %v1378_v27 = vadd.f32 %v3402_v36, %v1377_v32  ;;  %v1545_v51 = vmul.f32 %v3620_v30, %v1383_v9  ;;  %v2171_v6 = vpop.f32.mrf.mxu0 }
 0x283   : > { %v2183_v39 = vpop.f32.mrf.mxu1  ;;  %v3621_v37 = vunpack.i.l.bf16 %v3265_v33  ;;  %v1353_v20 = vadd.f32 %v2171_v6, %v3402_v36  ;;  %v1553_v35 = vadd.f32 %v1537_v0, %v3341_v14  ;;  %v888_v19 = vmul.f32 %v3626_v29, %v738_v38 }
 0x284   : > { %1566 = vst [vmem:[%s2891_s21] sm:$0xff] %v1550_v34  ;;  %1574 = vst [vmem:[%s2891_s21 + $0x40] sm:$0xff] %v1558_v59  ;;  %v1544_v45 = vmul.f32 %v3622_v15, %v1378_v27  ;;  %v1393_v21 = vadd.f32 %v2183_v39, %v3402_v36  ;;  %v1561_v33 = vadd.f32 %v1545_v51, %v1231_v55  ;;  %v1347_v44 = vpop.f32.mrf.mxu0  ;;  %v3627_v13 = vunpack.i.l.bf16 %v3237_v8 }
 0x285   : > { %v1536_v11 = vmul.f32 %v3621_v37, %v1338_v61  ;;  %v1387_v41 = vpop.f32.mrf.mxu1  ;;  %v1539_v24 = vmul.f32 %v3625_v4, %v1353_v20  ;;  %1569 = vst [vmem:[%s2891_s21 + $0x18] sm:$0xff] %v1553_v35  ;;  %v1348_v55 = vadd.f32 %v3402_v36, %v1347_v44  ;;  %v1232_v16 = vadd.f32 %v1216_v57, %v886_v3 }
 0x286   : > { %v1560_v40 = vadd.f32 %v1544_v45, %v1230_v52  ;;  %v1547_v46 = vmul.f32 %v2478_v50, %v1393_v21  ;;  %v1218_v14 = vmul.f32 %v3627_v13, %v1068_v17  ;;  %1577 = vst [vmem:[%s2891_s21 + $0x58] sm:$0xff] %v1561_v33  ;;  %v2174_v52 = vpop.f32.mrf.mxu0  ;;  %v1235_v54 = vadd.f32 %v1219_v31, %v889_v12 }
 0x287   : > { %v1552_v49 = vadd.f32 %v1536_v11, %v3343_v60  ;;  %v1388_v60 = vadd.f32 %v3402_v36, %v1387_v41  ;;  %v2186_v63 = vpop.f32.mrf.mxu1  ;;  %v1555_v50 = vadd.f32 %v1539_v24, %v3354_v1  ;;  %v1363_v53 = vadd.f32 %v2174_v52, %v3402_v36 }
 0x288   : > { %1576 = vst [vmem:[%s2891_s21 + $0x50] sm:$0xff] %v1560_v40  ;;  %v1563_v48 = vadd.f32 %v1547_v46, %v1233_v7  ;;  %v1403_v8 = vadd.f32 %v2186_v63, %v3402_v36  ;;  %v1538_v26 = vmul.f32 %v3628_v22, %v1348_v55  ;;  %v1357_v58 = vpop.f32.mrf.mxu0  ;;  %v3629_v1 = vunpack.i.h.bf16 %v3299_v42 }
 0x289   : > { %1568 = vst [vmem:[%s2891_s21 + $0x10] sm:$0xff] %v1552_v49  ;;  %v1546_v9 = vmul.f32 %v2477_v28, %v1388_v60  ;;  %v1397_v32 = vpop.f32.mrf.mxu1  ;;  %1571 = vst [vmem:[%s2891_s21 + $0x28] sm:$0xff] %v1555_v50  ;;  %v3630_v3 = vunpack.i.h.bf16 %v3363_v43  ;;  %v1358_v56 = vadd.f32 %v3402_v36, %v1357_v58  ;;  %v1226_v28 = vadd.f32 %v3426_v5, %v3420_v10 }
 0x28a   : > { %1579 = vst [vmem:[%s2891_s21 + $0x68] sm:$0xff] %v1563_v48  ;;  %v1541_v7 = vmul.f32 %v3629_v1, %v1363_v53  ;;  %v1398_v23 = vadd.f32 %v3402_v36, %v1397_v32  ;;  %v1234_v34 = vadd.f32 %v1218_v14, %v888_v19  ;;  %v1554_v59 = vadd.f32 %v1538_v26, %v3357_v25 }
 0x28b   : > { %v1549_v57 = vmul.f32 %v3630_v3, %v1403_v8  ;;  %v1562_v61 = vadd.f32 %v1546_v9, %v1232_v16  ;;  %v3631_v17 = vunpack.i.l.bf16 %v3299_v42  ;;  %v3632_v0 = vunpack.i.l.bf16 %v3363_v43 }
 0x28c   : > { %v1557_v27 = vadd.f32 %v1541_v7, %v3416_v62  ;;  %1570 = vst [vmem:[%s2891_s21 + $0x20] sm:$0xff] %v1554_v59 }
 0x28d   : > { %v1565_v38 = vadd.f32 %v1549_v57, %v1235_v54  ;;  %v1540_v2 = vmul.f32 %v3631_v17, %v1358_v56  ;;  %v1548_v30 = vmul.f32 %v3632_v0, %v1398_v23  ;;  %1578 = vst [vmem:[%s2891_s21 + $0x60] sm:$0xff] %v1562_v61 }
 0x28e   : > { %1573 = vst [vmem:[%s2891_s21 + $0x38] sm:$0xff] %v1557_v27 }
 0x28f   : > { %1581 = vst [vmem:[%s2891_s21 + $0x78] sm:$0xff] %v1565_v38  ;;  %v1556_v36 = vadd.f32 %v1540_v2, %v1226_v28  ;;  %v1564_v51 = vadd.f32 %v1548_v30, %v1234_v34 }
 0x291   : > { %1572 = vst [vmem:[%s2891_s21 + $0x30] sm:$0xff] %v1556_v36  ;;  %1580 = vst [vmem:[%s2891_s21 + $0x70] sm:$0xff] %v1564_v51 }
 0x292 PF: > { %s1834_s8 = sshll.u32 %s2640_s11, 5  ;;  %s1598_s25 = sshll.u32 %s2891_s21, 4  ;;  %s3516_s25 = int_to_ptr.vmem [resolvable:$true] %s1598_s25 }
 0x293   : > { %s1595_s20 = sadd.s32 %s2644_s12, %s1834_s8  ;;  %s3525_s18 = scalar_lea.sflag [#allocation7], %s332_s16 }
 0x294   : > { %s1831_s28 = sshll.u32 %s1595_s20, 7  ;;  %s2534_s17 = scalar_lea.vmem %s3516_s25, 2048 }
 0x295   : > { %s3521_s19 = scalar_lea.hbm %s3590_s6, %s1831_s28  ;;  %p2535_p1 = scmp.ne.s32.totalorder %s3516_s25, %s2534_s17 }
 0x296   : > { %s2666_s11 = smov [#allocation9]  }
 0x297   : > { %p2536_p2 = pnand %p2535_p1, %p2793_p8  ;;  %s2538_s12 = sshll.u32 %s2666_s11, 4  ;;  %s2539_s12 = int_to_ptr.vmem [resolvable:$false] %s2538_s12 }
 0x298   : > { %s2540_s21 = scalar_lea.vmem %s2539_s12, 4096  ;;  %p2541_p5 = scmp.lt.s32.totalorder %s3516_s25, %s2539_s12 }
 0x299   : > { %p2537_p4 = pneg %p2536_p2  ;;  %p2542_p6 = scmp.lt.s32.totalorder %s2540_s21, %s2534_s17 }
 0x29b   : > { %p2543_p7 = por %p2542_p6, %p2541_p5 }
 0x29d   : > { %p2544_p9 = pnand %p2543_p7, %p2537_p4 }
 0x29f   : > { %2547 = shalt.err (!%p2544_p9)
}
 0x2a0   : > { %s2548_s16 = scalar_lea.hbm %s3521_s19, 2048  ;;  %s2552_s26 = scalar_lea.hbm %s3590_s6, 32768 }
 0x2a1   : > { %p2549_p13 = scmp.ne.s32.totalorder %s3521_s19, %s2548_s16  ;;  %p2553_p3 = scmp.lt.s32.totalorder %s3521_s19, %s3590_s6 }
 0x2a2   : > { %p2554_p0 = scmp.lt.s32.totalorder %s2552_s26, %s2548_s16 }
 0x2a3   : > { %p2550_p10 = pnand %p2549_p13, %p2793_p8 }
 0x2a4   : > { %p2555_p1 = por %p2554_p0, %p2553_p3 }
 0x2a5   : > { %p2551_p12 = pneg %p2550_p10 }
 0x2a7   : > { %p2556_p2 = pnand %p2555_p1, %p2551_p12 }
 0x2a9   : > { %2559 = shalt.err (!%p2556_p2)
}
 0x2aa   : > { %s2667_s20 = smov 128   ;;  %s2668_s28 = smov 256  }
 0x2ab   : > { %s2669_s24 = smov 8  }
 0x2ac   : > { %2257 = dma.vmem_to_hbm [thread:$0]  (%p2793_p8), %s3516_s25, 2048, %s3521_s19, %s3525_s18, %s2667_s20, %s2668_s28, %s2669_s24  }
 0x2ad PF: > { %p2263_p4 = scmp.ge.s32.totalorder %s2656_s15, 2  ;;  %s1613_s10 = sand.u32 1, %s2616_s1  }
 0x2ae   : > { %s1614_s17 = scalar_lea.sflag [#allocation7], %s1613_s10 }
 0x2af   : > { %p2260_p5 = pnand %p2263_p4, %p2805_p11 }
 0x2b1   : > { %p2261_p6 = pneg %p2260_p5 }
 0x2b3   : > { %2611 = dma.done.wait (%p2261_p6), %s1614_s17, 2048  }
 0x2b4   : > { %2613 = vsyncadd (%p2261_p6), %s1614_s17, 4294965248  ;;  %s32_s15 = sadd.s32 1, %s2656_s15   ;;  %s3633_s27 = sld [smem:[#allocation13_spill]] }
 0x2b5   : > { %p29_p7 = scmp.ge.s32.totalorder %s32_s15, 18   ;;  %s3634_s10 = sld [smem:[#allocation17_spill]] }
 0x2b6   : > { %s3635_s11 = sld [smem:[#allocation14_spill]]  ;;  %s3638_s1 = smov %s2620_s30 }
 0x2b7   : > { %s3636_s13 = sld [smem:[#allocation15_spill]]  ;;  %s3639_s30 = smov %s2624_s7 }
 0x2b8   : > { %s3637_s25 = sld [smem:[#allocation16_spill]]  ;;  %s3640_s7 = smov %s2801_s29 }
 0x2b9   : > { %s3641_s8 = smov %s2632_s9  ;;  %s3643_s12 = smov %s2652_s14 }
 0x2ba   : > { %s3642_s9 = smov %s3633_s27  ;;  %31 = sbr.rel (!%p29_p7) target bundleno = 34 (0x22), region = 143 }
 0x2be   : > { %s3644_s14 = smov %s3637_s25 }
 0x2bf   :  { %1619 = vsyncpa [#allocation6], 1 }
 0x2c0   :  { %1621 = vsyncpa [#allocation6 + $0x1], 1 }
 0x2c1   :  { %1622 = vsyncpa [#allocation7], 1 }
 0x2c2   :  { %1624 = vsyncpa [#allocation7 + $0x1], 1 }

</bundles_post_ra>
